<compile_context>
chip_gen: v5e
topology: v5e:2x2
jax: 0.10.0
libtpu: 0.0.40
codegen_flags: <defaults>
</compile_context>

<pallas_src>
import functools

import jax
import jax.numpy as jnp
from jax import lax
from jax.experimental import pallas as pl
from jax.experimental.pallas import tpu as pltpu


_LP = 16  # sublane-aligned left offset of the image interior inside the VMEM scratch


def _round_up(x, m):
    return (x + m - 1) // m * m


def _sepconv_kernel(x_ref, top_ref, bot_ref, wf_ref, b_ref, o_ref, scr_ref, *,
                    th, H, W, C, Cout, mask_rows):
    """One (batch, row-tile) grid step.

    x_ref  : (1, th, W, C)   input rows [h*th, h*th + th)
    top_ref: (1, 1, W, C)    input row  max(h*th - 1, 0)      (halo above the tile)
    bot_ref: (1, 1, W, C)    input row  min(h*th + th, H - 1) (halo below the tile)
    wf_ref : (9, C, Cout)    fused depthwise*pointwise weights (MXU feed dtype)
    b_ref  : (1, Cout)       pointwise bias (f32)
    o_ref  : (1, th, W, Cout)
    scr_ref: (th+2, _LP+W+1, C) VMEM scratch holding the zero-bordered tile
    """
    h = pl.program_id(1)

    # In-kernel replacement for the old HBM-level jnp.pad: zero the scratch, then drop the
    # tile (+ valid halo rows) into its interior.  Border rows/cols that stay zero are the
    # "same"-padding halo.
    scr_ref[...] = jnp.zeros(scr_ref.shape, scr_ref.dtype)

    x = x_ref[0]                                             # (th, W, C)
    if mask_rows:
        # cdiv grid: rows past H in the last (partial) tile are unspecified -> zero them.
        rid = lax.broadcasted_iota(jnp.int32, (th, W), 0)
        x = jnp.where((h * th + rid < H)[:, :, None], x, jnp.zeros_like(x))
    scr_ref[1:th + 1, _LP:_LP + W, :] = x.astype(scr_ref.dtype)

    @pl.when(h > 0)                                          # top halo row (row -1 of tile)
    def _():
        scr_ref[0:1, _LP:_LP + W, :] = top_ref[0].astype(scr_ref.dtype)

    @pl.when((h + 1) * th < H)                               # bottom halo row (row th of tile)
    def _():
        scr_ref[th + 1:th + 2, _LP:_LP + W, :] = bot_ref[0].astype(scr_ref.dtype)

    # Hoist the three width-shifted views (the only sublane-misaligned reads) and reuse
    # them across the 3 kh taps: 3 relayouts instead of 9.
    xs = [scr_ref[:, _LP - 1 + kw:_LP - 1 + kw + W, :] for kw in range(3)]  # (th+2, W, C)

    # Depthwise folded into the pointwise contraction: out = sum_{kh,kw} shift(x) @ wf[kh,kw]
    # -> 9 accumulated MXU dots with f32 accumulation (no VPU MAC chain).
    acc = jnp.zeros((th * W, Cout), jnp.float32)
    for kh in range(3):
        for kw in range(3):
            piece = xs[kw][kh:kh + th].reshape(th * W, C)    # free relayout when W % 8 == 0
            acc = acc + jnp.dot(piece, wf_ref[kh * 3 + kw],
                                preferred_element_type=jnp.float32)

    out = acc + b_ref[...]                                   # (1, Cout) broadcast
    # TODO(synk): for Cout < 128 a lane-folded store (last dim W*Cout) would avoid masked
    # vst.msk partial stores; kept NHWC here to stay on proven reshape paths.
    o_ref[0] = out.reshape(th, W, Cout).astype(o_ref.dtype)


def separable_conv_block_nhwc(x, dw_weight, pw_weight, pw_bias, *,
                              tile_h=None, mxu_dtype=jnp.bfloat16):
    """NHWC-native separable conv block (preferred entry point — no layout transposes).

    x: (N, H, W, C); dw_weight: (3, 3, C); pw_weight: (C, Cout); pw_bias: (Cout,).
    Returns (N, H, W, Cout).  mxu_dtype=jnp.float32 gives a full-f32 accuracy path.
    """
    N, H, W, C = x.shape
    Cout = pw_weight.shape[-1]

    # Depthwise + pointwise are back-to-back linear maps -> fold into one (9, C, Cout)
    # contraction weight so the whole block runs on the MXU.
    wf = (dw_weight.astype(jnp.float32).reshape(9, C, 1)
          * pw_weight.astype(jnp.float32).reshape(1, C, Cout)).astype(mxu_dtype)
    bias = pw_bias.astype(jnp.float32).reshape(1, Cout)

    in_isz = jnp.dtype(x.dtype).itemsize
    out_isz = in_isz
    mxu_isz = jnp.dtype(mxu_dtype).itemsize

    def _phys(majors, sub, lanes, itemsize):
        # Physical VMEM bytes of a tile: sublane/lane padding included (conservative).
        sgran = max(8, 32 // max(1, itemsize))
        return majors * _round_up(sub, sgran) * _round_up(lanes, 128) * itemsize

    def footprint(th):
        fp = 2 * _phys(th, W, C, in_isz)                    # main input block (double-buffered)
        fp += 2 * 2 * _phys(1, W, C, in_isz)                # top/bottom halo rows
        fp += 2 * _phys(th, W, Cout, out_isz)               # output block (double-buffered)
        fp += _phys(9, C, Cout, mxu_isz) + _phys(1, 1, Cout, 4)   # resident weights + bias
        fp += _phys(th + 2, _LP + W + 1, C, mxu_isz)        # halo scratch
        # in-kernel temporaries: masked copy, 3 shifted views, reshaped pieces, f32 acc/out
        fp += 2 * _phys(th, W, C, max(in_isz, mxu_isz))
        fp += 3 * _phys(th + 2, W, C, mxu_isz)
        fp += 2 * _phys(th, W, C, mxu_isz)
        fp += 3 * _phys(1, th * W, Cout, 4)
        return fp

    # Generation-aware VMEM sizing (v5e/v6e: 128 MiB, v7x: 64 MiB per TensorCore).
    try:
        vmem_cap = int(pltpu.get_tpu_info().vmem_capacity_bytes)
    except Exception:
        vmem_cap = 64 * 2 ** 20
    if vmem_cap <= 0:
        vmem_cap = 64 * 2 ** 20
    budget = min(int(0.55 * vmem_cap), 96 * 2 ** 20)

    if tile_h is None:
        # Keep >= ~8 grid steps (pipeline depth + balanced v7x TensorCores), then take the
        # largest multiple-of-8 row tile that fits the VMEM budget.
        h_steps = max(1, -(-8 // max(1, N)))
        th = min(_round_up(H, 8), max(8, _round_up(-(-H // h_steps), 8)))
        while th > 8 and footprint(th) > budget:
            th -= 8
        tile_h = th
    tile_h = int(max(1, min(int(tile_h), _round_up(H, 8))))
    n_h = pl.cdiv(H, tile_h)
    mask_rows = (H % tile_h) != 0

    vmem_limit = int(min(int(0.85 * vmem_cap),
                         max(32 * 2 ** 20, 2 * footprint(tile_h) + 8 * 2 ** 20)))

    flops = 2 * N * H * W * 9 * C * Cout
    bytes_accessed = int(N * H * W * C * in_isz + N * H * W * Cout * out_isz
                         + wf.size * mxu_isz + bias.size * 4)

    kernel = functools.partial(_sepconv_kernel, th=tile_h, H=H, W=W, C=C, Cout=Cout,
                               mask_rows=mask_rows)

    grid_spec = pltpu.PrefetchScalarGridSpec(
        num_scalar_prefetch=0,
        grid=(N, n_h),
        in_specs=[
            pl.BlockSpec((1, tile_h, W, C), lambda n, h: (n, h, 0, 0)),
            # 1-row halo blocks (block size 1 on H => block index == element row), clamped
            # at the image boundary; the kernel zeroes them when out of range.
            pl.BlockSpec((1, 1, W, C),
                         lambda n, h: (n, jnp.maximum(h * tile_h - 1, 0), 0, 0)),
            pl.BlockSpec((1, 1, W, C),
                         lambda n, h: (n, jnp.minimum(h * tile_h + tile_h, H - 1), 0, 0)),
            pl.BlockSpec((9, C, Cout), lambda n, h: (0, 0, 0)),
            pl.BlockSpec((1, Cout), lambda n, h: (0, 0)),
        ],
        out_specs=pl.BlockSpec((1, tile_h, W, Cout), lambda n, h: (n, h, 0, 0)),
        scratch_shapes=[pltpu.VMEM((tile_h + 2, _LP + W + 1, C), mxu_dtype)],
    )

    return pl.pallas_call(
        kernel,
        out_shape=jax.ShapeDtypeStruct((N, H, W, Cout), x.dtype),
        grid_spec=grid_spec,
        compiler_params=pltpu.CompilerParams(
            dimension_semantics=("parallel", "parallel"),
            vmem_limit_bytes=vmem_limit),
        cost_estimate=pl.CostEstimate(flops=flops, transcendentals=0,
                                      bytes_accessed=bytes_accessed),
    )(x, x, x, wf, bias)


def separable_conv_block(x_nchw, dw_weight, pw_weight, pw_bias, **kwargs):
    """NCHW wrapper matching the PyTorch module's I/O convention.

    In an NHWC pipeline call separable_conv_block_nhwc directly — these two transposes are
    pure HBM overhead and exist only for PyTorch layout parity.
    """
    x_nhwc = jnp.transpose(x_nchw, (0, 2, 3, 1))
    y = separable_conv_block_nhwc(x_nhwc, dw_weight, pw_weight, pw_bias, **kwargs)
    return jnp.transpose(y, (0, 3, 1, 2))


def _reference(x_nchw, dw_weight, pw_weight, pw_bias):
    """Pure-JAX reference (lax conv, f32) for correctness check."""
    C = x_nchw.shape[1]
    dw_w = jnp.transpose(dw_weight, (2, 0, 1))[:, None, :, :]       # (C,1,3,3)
    y = jax.lax.conv_general_dilated(
        x_nchw.astype(jnp.float32), dw_w.astype(jnp.float32),
        window_strides=(1, 1), padding=((1, 1), (1, 1)),
        dimension_numbers=("NCHW", "OIHW", "NCHW"),
        feature_group_count=C)
    pw_w = jnp.transpose(pw_weight, (1, 0))[:, :, None, None]       # (Cout,C,1,1)
    z = jax.lax.conv_general_dilated(
        y, pw_w.astype(jnp.float32),
        window_strides=(1, 1), padding=((0, 0), (0, 0)),
        dimension_numbers=("NCHW", "OIHW", "NCHW"))
    return z + pw_bias.reshape(1, -1, 1, 1)


if __name__ == "__main__":
    key = jax.random.PRNGKey(0)
    N, C, H, W = 2, 4, 16, 16
    Cout = C  # out_channels defaults to in_channels

    k1, k2, k3, k4 = jax.random.split(key, 4)
    x_nchw = jax.random.normal(k1, (N, C, H, W), dtype=jnp.float32)
    # depthwise_conv: Conv2d(C, C, k=3, groups=C, bias=False) weights stored as (3,3,C)
    dw_weight = jax.random.normal(k2, (3, 3, C), dtype=jnp.float32) * 0.1
    # pointwise_conv: Conv2d(C, Cout, k=1, bias=True) weights stored as (C,Cout)
    pw_weight = jax.random.normal(k3, (C, Cout), dtype=jnp.float32) * 0.1
    pw_bias = jax.random.normal(k4, (Cout,), dtype=jnp.float32) * 0.1

    ref = _reference(x_nchw, dw_weight, pw_weight, pw_bias)

    # NHWC-native fast path (no transposes / HBM padding around the pallas_call).
    x_nhwc = jnp.transpose(x_nchw, (0, 2, 3, 1))
    out_nhwc = jax.block_until_ready(
        separable_conv_block_nhwc(x_nhwc, dw_weight, pw_weight, pw_bias))
    assert out_nhwc.shape == (N, H, W, Cout)
    # bf16 MXU feed (with f32 accumulation) slightly loosens tolerance vs the f32 reference.
    assert jnp.allclose(jnp.transpose(out_nhwc, (0, 3, 1, 2)), ref,
                        atol=2e-2, rtol=2e-2), "NHWC kernel mismatch vs reference"

    # NCHW compatibility wrapper (PyTorch I/O convention), explicit tile_h=8 -> grid (2, 2).
    out_nchw = jax.block_until_ready(
        separable_conv_block(x_nchw, dw_weight, pw_weight, pw_bias, tile_h=8))
    assert out_nchw.shape == (N, Cout, H, W)
    assert jnp.allclose(out_nchw, ref, atol=2e-2, rtol=2e-2), "NCHW wrapper mismatch vs reference"

    print("KERNEL_OK")
</pallas_src>

<mosaic_0001>
module attributes {stable_mosaic.version = 11 : i64} {
  func.func @_sepconv_kernel(%arg0: i32, %arg1: i32, %arg2: memref<1x8x16x4xf32, #tpu.memory_space<vmem>>, %arg3: memref<1x1x16x4xf32, #tpu.memory_space<vmem>>, %arg4: memref<1x1x16x4xf32, #tpu.memory_space<vmem>>, %arg5: memref<9x4x4xbf16, #tpu.memory_space<vmem>>, %arg6: memref<1x4xf32, #tpu.memory_space<vmem>>, %arg7: memref<1x8x16x4xf32, #tpu.memory_space<vmem>>, %arg8: memref<10x33x4xbf16, #tpu.memory_space<vmem>>) attributes {dimension_semantics = [#tpu.dimension_semantics<parallel>, #tpu.dimension_semantics<parallel>], iteration_bounds = array<i64: 2, 2>, scalar_prefetch = 0 : i64, scratch_operands = 1 : i64, tpu.core_type = #tpu.core_type<tc>, window_params = [{transform_indices = @transform_0, window_bounds = array<i64: 1, 8, 16, 4>}, {transform_indices = @transform_1, window_bounds = array<i64: 1, 1, 16, 4>}, {transform_indices = @transform_2, window_bounds = array<i64: 1, 1, 16, 4>}, {pipeline_mode = #tpu.pipeline_mode<synchronous>, transform_indices = @transform_3, window_bounds = array<i64: 9, 4, 4>}, {pipeline_mode = #tpu.pipeline_mode<synchronous>, transform_indices = @transform_4, window_bounds = array<i64: 1, 4>}, {transform_indices = @transform_5, window_bounds = array<i64: 1, 8, 16, 4>}]} {
    %cst = arith.constant 0.000000e+00 : bf16
    %0 = vector.broadcast %cst : bf16 to vector<10x33x4xbf16>
    %c0 = arith.constant 0 : index
    %c0_0 = arith.constant 0 : index
    %c0_1 = arith.constant 0 : index
    %1 = vector.load %arg8[%c0, %c0_0, %c0_1] : memref<10x33x4xbf16, #tpu.memory_space<vmem>>, vector<10x33x4xbf16>
    tpu.vector_store %arg8[%c0, %c0_0, %c0_1], %0 {strides = array<i32>} : memref<10x33x4xbf16, #tpu.memory_space<vmem>>, vector<10x33x4xbf16>,
    %c0_2 = arith.constant 0 : index
    %c0_3 = arith.constant 0 : index
    %c0_4 = arith.constant 0 : index
    %c0_5 = arith.constant 0 : index
    %2 = vector.load %arg2[%c0_2, %c0_3, %c0_4, %c0_5] : memref<1x8x16x4xf32, #tpu.memory_space<vmem>>, vector<1x8x16x4xf32>
    %3 = vector.shape_cast %2 : vector<1x8x16x4xf32> to vector<8x16x4xf32>
    %4 = arith.truncf %3 : vector<8x16x4xf32> to vector<8x16x4xbf16>
    %c1 = arith.constant 1 : index
    %c16 = arith.constant 16 : index
    %c0_6 = arith.constant 0 : index
    %5 = vector.load %arg8[%c1, %c16, %c0_6] : memref<10x33x4xbf16, #tpu.memory_space<vmem>>, vector<8x16x4xbf16>
    tpu.vector_store %arg8[%c1, %c16, %c0_6], %4 {strides = array<i32>} : memref<10x33x4xbf16, #tpu.memory_space<vmem>>, vector<8x16x4xbf16>,
    %c0_i32 = arith.constant 0 : i32
    %6 = arith.cmpi sgt, %arg1, %c0_i32 : i32
    %7 = arith.extui %6 : i1 to i32
    %c0_i32_7 = arith.constant 0 : i32
    %8 = arith.cmpi ne, %7, %c0_i32_7 : i32
    scf.if %8 {
      %c0_52 = arith.constant 0 : index
      %c0_53 = arith.constant 0 : index
      %c0_54 = arith.constant 0 : index
      %c0_55 = arith.constant 0 : index
      %79 = vector.load %arg3[%c0_52, %c0_53, %c0_54, %c0_55] : memref<1x1x16x4xf32, #tpu.memory_space<vmem>>, vector<1x1x16x4xf32>
      %80 = vector.shape_cast %79 : vector<1x1x16x4xf32> to vector<1x16x4xf32>
      %81 = arith.truncf %80 : vector<1x16x4xf32> to vector<1x16x4xbf16>
      %c0_56 = arith.constant 0 : index
      %c16_57 = arith.constant 16 : index
      %c0_58 = arith.constant 0 : index
      %82 = vector.load %arg8[%c0_56, %c16_57, %c0_58] : memref<10x33x4xbf16, #tpu.memory_space<vmem>>, vector<1x16x4xbf16>
      tpu.vector_store %arg8[%c0_56, %c16_57, %c0_58], %81 {strides = array<i32>} : memref<10x33x4xbf16, #tpu.memory_space<vmem>>, vector<1x16x4xbf16>,
    } else {
    }
    %c1_i32 = arith.constant 1 : i32
    %9 = arith.addi %arg1, %c1_i32 : i32
    %c8_i32 = arith.constant 8 : i32
    %10 = arith.muli %9, %c8_i32 : i32
    %c16_i32 = arith.constant 16 : i32
    %11 = arith.cmpi slt, %10, %c16_i32 : i32
    %12 = arith.extui %11 : i1 to i32
    %c0_i32_8 = arith.constant 0 : i32
    %13 = arith.cmpi ne, %12, %c0_i32_8 : i32
    scf.if %13 {
      %c0_52 = arith.constant 0 : index
      %c0_53 = arith.constant 0 : index
      %c0_54 = arith.constant 0 : index
      %c0_55 = arith.constant 0 : index
      %79 = vector.load %arg4[%c0_52, %c0_53, %c0_54, %c0_55] : memref<1x1x16x4xf32, #tpu.memory_space<vmem>>, vector<1x1x16x4xf32>
      %80 = vector.shape_cast %79 : vector<1x1x16x4xf32> to vector<1x16x4xf32>
      %81 = arith.truncf %80 : vector<1x16x4xf32> to vector<1x16x4xbf16>
      %c9 = arith.constant 9 : index
      %c16_56 = arith.constant 16 : index
      %c0_57 = arith.constant 0 : index
      %82 = vector.load %arg8[%c9, %c16_56, %c0_57] : memref<10x33x4xbf16, #tpu.memory_space<vmem>>, vector<1x16x4xbf16>
      tpu.vector_store %arg8[%c9, %c16_56, %c0_57], %81 {strides = array<i32>} : memref<10x33x4xbf16, #tpu.memory_space<vmem>>, vector<1x16x4xbf16>,
    } else {
    }
    %c0_9 = arith.constant 0 : index
    %c15 = arith.constant 15 : index
    %c0_10 = arith.constant 0 : index
    %14 = vector.load %arg8[%c0_9, %c15, %c0_10] : memref<10x33x4xbf16, #tpu.memory_space<vmem>>, vector<10x16x4xbf16>
    %c0_11 = arith.constant 0 : index
    %c16_12 = arith.constant 16 : index
    %c0_13 = arith.constant 0 : index
    %15 = vector.load %arg8[%c0_11, %c16_12, %c0_13] : memref<10x33x4xbf16, #tpu.memory_space<vmem>>, vector<10x16x4xbf16>
    %c0_14 = arith.constant 0 : index
    %c17 = arith.constant 17 : index
    %c0_15 = arith.constant 0 : index
    %16 = vector.load %arg8[%c0_14, %c17, %c0_15] : memref<10x33x4xbf16, #tpu.memory_space<vmem>>, vector<10x16x4xbf16>
    %cst_16 = arith.constant 0.000000e+00 : f32
    %17 = vector.broadcast %cst_16 : f32 to vector<128x4xf32>
    %18 = vector.extract_strided_slice %14 {offsets = [0, 0, 0], sizes = [8, 16, 4], strides = [1, 1, 1]} : vector<10x16x4xbf16> to vector<8x16x4xbf16>
    %19 = vector.shape_cast %18 : vector<8x16x4xbf16> to vector<128x4xbf16>
    %c0_17 = arith.constant 0 : index
    %c0_18 = arith.constant 0 : index
    %c0_19 = arith.constant 0 : index
    %20 = vector.load %arg5[%c0_17, %c0_18, %c0_19] : memref<9x4x4xbf16, #tpu.memory_space<vmem>>, vector<1x4x4xbf16>
    %21 = vector.shape_cast %20 : vector<1x4x4xbf16> to vector<4x4xbf16>
    %cst_20 = arith.constant dense<0.000000e+00> : vector<128x4xf32>
    %22 = tpu.matmul %19, %21, %cst_20 {dimension_numbers = #tpu.dot_dimension_numbers<[1], [0], [0], [1], [0, 0, 1, 1], [], []>} : vector<128x4xbf16>, vector<4x4xbf16>, vector<128x4xf32> -> vector<128x4xf32>
    %23 = arith.addf %17, %22 : vector<128x4xf32>
    %24 = vector.extract_strided_slice %15 {offsets = [0, 0, 0], sizes = [8, 16, 4], strides = [1, 1, 1]} : vector<10x16x4xbf16> to vector<8x16x4xbf16>
    %25 = vector.shape_cast %24 : vector<8x16x4xbf16> to vector<128x4xbf16>
    %c1_21 = arith.constant 1 : index
    %c0_22 = arith.constant 0 : index
    %c0_23 = arith.constant 0 : index
    %26 = vector.load %arg5[%c1_21, %c0_22, %c0_23] : memref<9x4x4xbf16, #tpu.memory_space<vmem>>, vector<1x4x4xbf16>
    %27 = vector.shape_cast %26 : vector<1x4x4xbf16> to vector<4x4xbf16>
    %cst_24 = arith.constant dense<0.000000e+00> : vector<128x4xf32>
    %28 = tpu.matmul %25, %27, %cst_24 {dimension_numbers = #tpu.dot_dimension_numbers<[1], [0], [0], [1], [0, 0, 1, 1], [], []>} : vector<128x4xbf16>, vector<4x4xbf16>, vector<128x4xf32> -> vector<128x4xf32>
    %29 = arith.addf %23, %28 : vector<128x4xf32>
    %30 = vector.extract_strided_slice %16 {offsets = [0, 0, 0], sizes = [8, 16, 4], strides = [1, 1, 1]} : vector<10x16x4xbf16> to vector<8x16x4xbf16>
    %31 = vector.shape_cast %30 : vector<8x16x4xbf16> to vector<128x4xbf16>
    %c2 = arith.constant 2 : index
    %c0_25 = arith.constant 0 : index
    %c0_26 = arith.constant 0 : index
    %32 = vector.load %arg5[%c2, %c0_25, %c0_26] : memref<9x4x4xbf16, #tpu.memory_space<vmem>>, vector<1x4x4xbf16>
    %33 = vector.shape_cast %32 : vector<1x4x4xbf16> to vector<4x4xbf16>
    %cst_27 = arith.constant dense<0.000000e+00> : vector<128x4xf32>
    %34 = tpu.matmul %31, %33, %cst_27 {dimension_numbers = #tpu.dot_dimension_numbers<[1], [0], [0], [1], [0, 0, 1, 1], [], []>} : vector<128x4xbf16>, vector<4x4xbf16>, vector<128x4xf32> -> vector<128x4xf32>
    %35 = arith.addf %29, %34 : vector<128x4xf32>
    %36 = vector.extract_strided_slice %14 {offsets = [1, 0, 0], sizes = [8, 16, 4], strides = [1, 1, 1]} : vector<10x16x4xbf16> to vector<8x16x4xbf16>
    %37 = vector.shape_cast %36 : vector<8x16x4xbf16> to vector<128x4xbf16>
    %c3 = arith.constant 3 : index
    %c0_28 = arith.constant 0 : index
    %c0_29 = arith.constant 0 : index
    %38 = vector.load %arg5[%c3, %c0_28, %c0_29] : memref<9x4x4xbf16, #tpu.memory_space<vmem>>, vector<1x4x4xbf16>
    %39 = vector.shape_cast %38 : vector<1x4x4xbf16> to vector<4x4xbf16>
    %cst_30 = arith.constant dense<0.000000e+00> : vector<128x4xf32>
    %40 = tpu.matmul %37, %39, %cst_30 {dimension_numbers = #tpu.dot_dimension_numbers<[1], [0], [0], [1], [0, 0, 1, 1], [], []>} : vector<128x4xbf16>, vector<4x4xbf16>, vector<128x4xf32> -> vector<128x4xf32>
    %41 = arith.addf %35, %40 : vector<128x4xf32>
    %42 = vector.extract_strided_slice %15 {offsets = [1, 0, 0], sizes = [8, 16, 4], strides = [1, 1, 1]} : vector<10x16x4xbf16> to vector<8x16x4xbf16>
    %43 = vector.shape_cast %42 : vector<8x16x4xbf16> to vector<128x4xbf16>
    %c4 = arith.constant 4 : index
    %c0_31 = arith.constant 0 : index
    %c0_32 = arith.constant 0 : index
    %44 = vector.load %arg5[%c4, %c0_31, %c0_32] : memref<9x4x4xbf16, #tpu.memory_space<vmem>>, vector<1x4x4xbf16>
    %45 = vector.shape_cast %44 : vector<1x4x4xbf16> to vector<4x4xbf16>
    %cst_33 = arith.constant dense<0.000000e+00> : vector<128x4xf32>
    %46 = tpu.matmul %43, %45, %cst_33 {dimension_numbers = #tpu.dot_dimension_numbers<[1], [0], [0], [1], [0, 0, 1, 1], [], []>} : vector<128x4xbf16>, vector<4x4xbf16>, vector<128x4xf32> -> vector<128x4xf32>
    %47 = arith.addf %41, %46 : vector<128x4xf32>
    %48 = vector.extract_strided_slice %16 {offsets = [1, 0, 0], sizes = [8, 16, 4], strides = [1, 1, 1]} : vector<10x16x4xbf16> to vector<8x16x4xbf16>
    %49 = vector.shape_cast %48 : vector<8x16x4xbf16> to vector<128x4xbf16>
    %c5 = arith.constant 5 : index
    %c0_34 = arith.constant 0 : index
    %c0_35 = arith.constant 0 : index
    %50 = vector.load %arg5[%c5, %c0_34, %c0_35] : memref<9x4x4xbf16, #tpu.memory_space<vmem>>, vector<1x4x4xbf16>
    %51 = vector.shape_cast %50 : vector<1x4x4xbf16> to vector<4x4xbf16>
    %cst_36 = arith.constant dense<0.000000e+00> : vector<128x4xf32>
    %52 = tpu.matmul %49, %51, %cst_36 {dimension_numbers = #tpu.dot_dimension_numbers<[1], [0], [0], [1], [0, 0, 1, 1], [], []>} : vector<128x4xbf16>, vector<4x4xbf16>, vector<128x4xf32> -> vector<128x4xf32>
    %53 = arith.addf %47, %52 : vector<128x4xf32>
    %54 = vector.extract_strided_slice %14 {offsets = [2, 0, 0], sizes = [8, 16, 4], strides = [1, 1, 1]} : vector<10x16x4xbf16> to vector<8x16x4xbf16>
    %55 = vector.shape_cast %54 : vector<8x16x4xbf16> to vector<128x4xbf16>
    %c6 = arith.constant 6 : index
    %c0_37 = arith.constant 0 : index
    %c0_38 = arith.constant 0 : index
    %56 = vector.load %arg5[%c6, %c0_37, %c0_38] : memref<9x4x4xbf16, #tpu.memory_space<vmem>>, vector<1x4x4xbf16>
    %57 = vector.shape_cast %56 : vector<1x4x4xbf16> to vector<4x4xbf16>
    %cst_39 = arith.constant dense<0.000000e+00> : vector<128x4xf32>
    %58 = tpu.matmul %55, %57, %cst_39 {dimension_numbers = #tpu.dot_dimension_numbers<[1], [0], [0], [1], [0, 0, 1, 1], [], []>} : vector<128x4xbf16>, vector<4x4xbf16>, vector<128x4xf32> -> vector<128x4xf32>
    %59 = arith.addf %53, %58 : vector<128x4xf32>
    %60 = vector.extract_strided_slice %15 {offsets = [2, 0, 0], sizes = [8, 16, 4], strides = [1, 1, 1]} : vector<10x16x4xbf16> to vector<8x16x4xbf16>
    %61 = vector.shape_cast %60 : vector<8x16x4xbf16> to vector<128x4xbf16>
    %c7 = arith.constant 7 : index
    %c0_40 = arith.constant 0 : index
    %c0_41 = arith.constant 0 : index
    %62 = vector.load %arg5[%c7, %c0_40, %c0_41] : memref<9x4x4xbf16, #tpu.memory_space<vmem>>, vector<1x4x4xbf16>
    %63 = vector.shape_cast %62 : vector<1x4x4xbf16> to vector<4x4xbf16>
    %cst_42 = arith.constant dense<0.000000e+00> : vector<128x4xf32>
    %64 = tpu.matmul %61, %63, %cst_42 {dimension_numbers = #tpu.dot_dimension_numbers<[1], [0], [0], [1], [0, 0, 1, 1], [], []>} : vector<128x4xbf16>, vector<4x4xbf16>, vector<128x4xf32> -> vector<128x4xf32>
    %65 = arith.addf %59, %64 : vector<128x4xf32>
    %66 = vector.extract_strided_slice %16 {offsets = [2, 0, 0], sizes = [8, 16, 4], strides = [1, 1, 1]} : vector<10x16x4xbf16> to vector<8x16x4xbf16>
    %67 = vector.shape_cast %66 : vector<8x16x4xbf16> to vector<128x4xbf16>
    %c8 = arith.constant 8 : index
    %c0_43 = arith.constant 0 : index
    %c0_44 = arith.constant 0 : index
    %68 = vector.load %arg5[%c8, %c0_43, %c0_44] : memref<9x4x4xbf16, #tpu.memory_space<vmem>>, vector<1x4x4xbf16>
    %69 = vector.shape_cast %68 : vector<1x4x4xbf16> to vector<4x4xbf16>
    %cst_45 = arith.constant dense<0.000000e+00> : vector<128x4xf32>
    %70 = tpu.matmul %67, %69, %cst_45 {dimension_numbers = #tpu.dot_dimension_numbers<[1], [0], [0], [1], [0, 0, 1, 1], [], []>} : vector<128x4xbf16>, vector<4x4xbf16>, vector<128x4xf32> -> vector<128x4xf32>
    %71 = arith.addf %65, %70 : vector<128x4xf32>
    %c0_46 = arith.constant 0 : index
    %c0_47 = arith.constant 0 : index
    %72 = vector.load %arg6[%c0_46, %c0_47] : memref<1x4xf32, #tpu.memory_space<vmem>>, vector<1x4xf32>
    %73 = vector.broadcast %72 : vector<1x4xf32> to vector<128x4xf32>
    %74 = arith.addf %71, %73 : vector<128x4xf32>
    %75 = vector.shape_cast %74 : vector<128x4xf32> to vector<8x16x4xf32>
    %c0_48 = arith.constant 0 : index
    %c0_49 = arith.constant 0 : index
    %c0_50 = arith.constant 0 : index
    %c0_51 = arith.constant 0 : index
    %76 = vector.load %arg7[%c0_48, %c0_49, %c0_50, %c0_51] : memref<1x8x16x4xf32, #tpu.memory_space<vmem>>, vector<1x8x16x4xf32>
    %77 = vector.shape_cast %76 : vector<1x8x16x4xf32> to vector<8x16x4xf32>
    %78 = vector.shape_cast %75 : vector<8x16x4xf32> to vector<1x8x16x4xf32>
    tpu.vector_store %arg7[%c0_48, %c0_49, %c0_50, %c0_51], %78 {strides = array<i32>} : memref<1x8x16x4xf32, #tpu.memory_space<vmem>>, vector<1x8x16x4xf32>,
    return
  }
  func.func @transform_0(%arg0: i32, %arg1: i32) -> (i32, i32, i32, i32) {
    %c0_i32 = arith.constant 0 : i32
    %c0_i32_0 = arith.constant 0 : i32
    %c0_i32_1 = arith.constant 0 : i32
    return %arg0, %arg1, %c0_i32, %c0_i32_0 : i32, i32, i32, i32
  }
  func.func @transform_1(%arg0: i32, %arg1: i32) -> (i32, i32, i32, i32) {
    %c8_i32 = arith.constant 8 : i32
    %0 = arith.muli %arg1, %c8_i32 : i32
    %c1_i32 = arith.constant 1 : i32
    %1 = arith.subi %0, %c1_i32 : i32
    %c0_i32 = arith.constant 0 : i32
    %2 = arith.maxsi %1, %c0_i32 : i32
    %c0_i32_0 = arith.constant 0 : i32
    %c0_i32_1 = arith.constant 0 : i32
    %c0_i32_2 = arith.constant 0 : i32
    return %arg0, %2, %c0_i32_0, %c0_i32_1 : i32, i32, i32, i32
  }
  func.func @transform_2(%arg0: i32, %arg1: i32) -> (i32, i32, i32, i32) {
    %c8_i32 = arith.constant 8 : i32
    %0 = arith.muli %arg1, %c8_i32 : i32
    %c8_i32_0 = arith.constant 8 : i32
    %1 = arith.addi %0, %c8_i32_0 : i32
    %c15_i32 = arith.constant 15 : i32
    %2 = arith.minsi %1, %c15_i32 : i32
    %c0_i32 = arith.constant 0 : i32
    %c0_i32_1 = arith.constant 0 : i32
    %c0_i32_2 = arith.constant 0 : i32
    return %arg0, %2, %c0_i32, %c0_i32_1 : i32, i32, i32, i32
  }
  func.func @transform_3(%arg0: i32, %arg1: i32) -> (i32, i32, i32) {
    %c0_i32 = arith.constant 0 : i32
    %c0_i32_0 = arith.constant 0 : i32
    %c0_i32_1 = arith.constant 0 : i32
    %c0_i32_2 = arith.constant 0 : i32
    return %c0_i32, %c0_i32_0, %c0_i32_1 : i32, i32, i32
  }
  func.func @transform_4(%arg0: i32, %arg1: i32) -> (i32, i32) {
    %c0_i32 = arith.constant 0 : i32
    %c0_i32_0 = arith.constant 0 : i32
    %c0_i32_1 = arith.constant 0 : i32
    return %c0_i32, %c0_i32_0 : i32, i32
  }
  func.func @transform_5(%arg0: i32, %arg1: i32) -> (i32, i32, i32, i32) {
    %c0_i32 = arith.constant 0 : i32
    %c0_i32_0 = arith.constant 0 : i32
    %c0_i32_1 = arith.constant 0 : i32
    return %arg0, %arg1, %c0_i32, %c0_i32_0 : i32, i32, i32, i32
  }
}

</mosaic_0001>

<bundles_post_ra>
// kernel: tpu_custom_call.1
= control target key start
LH: loop header
LB: loop body
LE: loop exit
PB: predicated region body
PF: predicated region fallthrough
CT: control target
= control target key end

     0   :  { %s2222_s18 = smov 0   ;;  %s2224_s19 = smov 0   ;;  %s2908_s0 = inlined_call_operand.vmem [shape: f32[2,16,16,4], index: 0, kind: input, shape index: {}]   ;;  %s2909_s1 = inlined_call_operand.vmem [shape: f32[2,16,16,4], index: 1, kind: input, shape index: {}]   ;;  %s2910_s2 = inlined_call_operand.vmem [shape: f32[2,16,16,4], index: 2, kind: input, shape index: {}]   ;;  %s2911_s3 = inlined_call_operand.vmem [shape: bf16[9,4,4], index: 3, kind: input, shape index: {}]   ;;  %s2912_s4 = inlined_call_operand.vmem [shape: f32[1,4], index: 4, kind: input, shape index: {}]   ;;  %s2913_s5 = inlined_call_operand.vmem [shape: f32[2,16,16,4], index: 5, kind: output, shape index: {}]  }
   0x1   :  { %s2226_s20 = smov 0   ;;  %s2228_s21 = smov 0  }
   0x2   :  { %s2230_s22 = smov 0  }
   0x3 LB: > { %s24_s23 = sadd.s32 1, %s2181_s20  ;;  %s27_s24 = sadd.s32 1, %s2185_s21  ;;  %s2189_s22 = sphi %s2230_s22, %s15_s22   ;;  %s2185_s21 = sphi %s2228_s21, %s2923_s21   ;;  %s2181_s20 = sphi %s2226_s20, %s2922_s20   ;;  %s2177_s19 = sphi %s2224_s19, %s2921_s19   ;;  %s2173_s18 = sphi %s2222_s18, %s2920_s18  }
   0x4   : > { %p25_p0 = scmp.ge.s32.totalorder %s24_s23, 2  ;;  %p1931_p1 = scmp.ge.s32.totalorder %s2189_s22, 1 }
   0x5   : > { %p273_p2 = scmp.lt.s32.totalorder %s2189_s22, 5 }
   0x6   : > { %s2925_s23 = smov (%p25_p0, %s24_s23), 0  ;;  %s2927_s24 = smov (!%p25_p0, %s27_s24), %s2185_s21 }
   0x7   : > { %p274_p3 = pnand %p1931_p1, %p273_p2  ;;  %p29_p4 = scmp.ge.s32.totalorder %s2927_s24, 2 }
   0x8   : > { %s1932_s25 = sshll.u32 (!%p274_p3), %s2173_s18, 3  ;;  %p338_p5 = scmp.lt.s32.totalorder (!%p274_p3), %s2177_s19, 1 }
   0x9   : > { %s2929_s24 = smov (%p29_p4, %s2927_s24), 0  ;;  %277 = sbr.rel (%p274_p3) target bundleno = 514 (0x202), region = 40 }
   0xa   : > { %p340_p6 = scmp.lt.s32.totalorder (!%p274_p3), %s1932_s25, 15  ;;  %s1937_s26 = sadd.s32 (!%p274_p3), 4294967295, %s1932_s25 }
   0xb   : > { %p350_p7 = scmp.gt.s32.totalorder (!%p274_p3), %s1937_s26, 0  ;;  %p1938_p8 = scmp.lt.s32.totalorder (!%p274_p3), %s1937_s26, 15 }
   0xc   : > { %s2273_s7 = sadd.s32 (!%p274_p3), 8, %s1932_s25  ;;  %p1957_p10 = scmp.le.s32.totalorder (!%p274_p3), %s2173_s18, 0 }
   0xd   : > { %p367_p9 = scmp.lt.s32.totalorder (!%p274_p3), %s2273_s7, 15 }
   0xe   : > { %vm394_vm0 = vcmask 27648   ;;  %v2191_v0 = vmov 0   ;;  %s2931_s19 = smov (!%p338_p5, %s2177_s19), 1  ;;  %s2933_s26 = smov (!%p350_p7, %s1937_s26), 0  ;;  %vm399_vm1 = vcmask 24576  }
   0xf   : > { %407 = vst.msk [vmem:[#allocation2 + $0x1c] sm:$0xf] %vm394_vm0, %v2191_v0  ;;  %s341_s27 = scalar_select %p340_p6, %s1932_s25, 15  ;;  %vm400_vm2 = vsmask.f32 256 }
  0x10   : > { %396 = vst.msk [vmem:[#allocation2 + $0x4] sm:$0xf] %vm394_vm0, %v2191_v0  ;;  %s2261_s28 = sshll.u32 %s2931_s19, 5  ;;  %s2935_s26 = smov (!%p1938_p8, %s2933_s26), 15  ;;  %vm2337_vm3 = vmand %vm399_vm1, %vm400_vm2  ;;  %v402_v2 = vld [vmem:[#allocation2 + $0x10] sm:$0x1] }
  0x11   : > { %397 = vst.msk [vmem:[#allocation2 + $0x8] sm:$0xf] %vm394_vm0, %v2191_v0  ;;  %s1933_s29 = sshll.u32 %s341_s27, 1  ;;  %s1943_s12 = sshll.u32 %s2935_s26, 1  ;;  %v409_v3 = vld [vmem:[#allocation2 + $0x24] sm:$0x1] }
  0x12   : > { %398 = vst.msk [vmem:[#allocation2 + $0xc] sm:$0xf] %vm394_vm0, %v2191_v0  ;;  %s2266_s30 = sadd.s32 %s2261_s28, %s1933_s29  ;;  %s358_s13 = sadd.s32 %s1943_s12, %s2261_s28  ;;  %v416_v4 = vld [vmem:[#allocation2 + $0x38] sm:$0x1]  ;;  %v403_v5 = vsel %vm2337_vm3, 0, %v402_v2  ;;  %v410_v7 = vsel %vm2337_vm3, 0, %v409_v3 }
  0x13   : > { %406 = vst.msk [vmem:[#allocation2 + $0x18] sm:$0xf] %vm394_vm0, %v2191_v0  ;;  %s1935_s6 = sshll.u32 %s2266_s30, 3  ;;  %s1945_s14 = sshll.u32 %s358_s13, 3  ;;  %v423_v6 = vld [vmem:[#allocation2 + $0x4c] sm:$0x1] }
  0x14   : > { %408 = vst.msk [vmem:[#allocation2 + $0x20] sm:$0xf] %vm394_vm0, %v2191_v0  ;;  %s2283_s10 = scalar_lea.vmem %s2913_s5, %s1935_s6  ;;  %s2300_s17 = scalar_lea.vmem %s2909_s1, %s1945_s14  ;;  %v430_v8 = vld [vmem:[#allocation2 + $0x60] sm:$0x1]  ;;  %v417_v9 = vsel %vm2337_vm3, 0, %v416_v4  ;;  %v424_v11 = vsel %vm2337_vm3, 0, %v423_v6 }
  0x15   : > { %413 = vst.msk [vmem:[#allocation2 + $0x2c] sm:$0xf] %vm394_vm0, %v2191_v0  ;;  %s368_s11 = scalar_select %p367_p9, %s2273_s7, 15  ;;  %v437_v10 = vld [vmem:[#allocation2 + $0x74] sm:$0x1]  ;;  %v431_v13 = vsel %vm2337_vm3, 0, %v430_v8 }
  0x16   : > { %414 = vst.msk [vmem:[#allocation2 + $0x30] sm:$0xf] %vm394_vm0, %v2191_v0  ;;  %v444_v12 = vld [vmem:[#allocation2 + $0x88] sm:$0x1]  ;;  %v451_v14 = vld [vmem:[#allocation2 + $0x9c] sm:$0x1] }
  0x17   : > { %415 = vst.msk [vmem:[#allocation2 + $0x34] sm:$0xf] %vm394_vm0, %v2191_v0  ;;  %s2937_s11 = smov (!%p367_p9, %s368_s11), 15  ;;  %v438_v15 = vsel %vm2337_vm3, 0, %v437_v10  ;;  %v458_v16 = vld [vmem:[#allocation2 + $0xb0] sm:$0x1] }
  0x18   : > { %420 = vst.msk [vmem:[#allocation2 + $0x40] sm:$0xf] %vm394_vm0, %v2191_v0  ;;  %s1950_s19 = sshll.u32 %s2937_s11, 1  ;;  %s2362_s11 = scalar_lea.vmem %s2908_s0, %s1935_s6  ;;  %v445_v17 = vsel %vm2337_vm3, 0, %v444_v12  ;;  %v465_v18 = vld [vmem:[#allocation2 + $0xc4] sm:$0x1] }
  0x19   : > { %421 = vst.msk [vmem:[#allocation2 + $0x44] sm:$0xf] %vm394_vm0, %v2191_v0  ;;  %s375_s25 = sadd.s32 %s1950_s19, %s2261_s28  ;;  %v468_v19 = vld [vmem:[%s2362_s11] sm:$0xff]  ;;  %v452_v20 = vsel %vm2337_vm3, 0, %v451_v14  ;;  %v469_v21 = vld [vmem:[%s2362_s11 + $0x8] sm:$0xff]  ;;  %v459_v22 = vsel %vm2337_vm3, 0, %v458_v16 }
  0x1a   : > { %422 = vst.msk [vmem:[#allocation2 + $0x48] sm:$0xf] %vm394_vm0, %v2191_v0  ;;  %s1952_s26 = sshll.u32 %s375_s25, 3  ;;  %v470_v23 = vld [vmem:[%s2362_s11 + $0x10] sm:$0xff]  ;;  %v466_v24 = vsel %vm2337_vm3, 0, %v465_v18  ;;  %v484_v25 = vpack.c.bf16 %v468_v19, %v468_v19  ;;  %v471_v26 = vld [vmem:[%s2362_s11 + $0x18] sm:$0xff]  ;;  %v485_v27 = vpack.c.bf16 %v469_v21, %v469_v21 }
  0x1b   : > { %427 = vst.msk [vmem:[#allocation2 + $0x54] sm:$0xf] %vm394_vm0, %v2191_v0  ;;  %s2314_s8 = scalar_lea.vmem %s2910_s2, %s1952_s26  ;;  %v472_v28 = vld [vmem:[%s2362_s11 + $0x20] sm:$0xff]  ;;  %v486_v29 = vpack.c.bf16 %v470_v23, %v470_v23  ;;  %v473_v30 = vld [vmem:[%s2362_s11 + $0x28] sm:$0xff]  ;;  %v487_v31 = vpack.c.bf16 %v471_v26, %v471_v26  ;;  %v474_v32 = vld [vmem:[%s2362_s11 + $0x30] sm:$0xff] }
  0x1c   : > { %428 = vst.msk [vmem:[#allocation2 + $0x58] sm:$0xf] %vm394_vm0, %v2191_v0  ;;  %v488_v33 = vpack.c.bf16 %v472_v28, %v472_v28  ;;  %v475_v34 = vld [vmem:[%s2362_s11 + $0x38] sm:$0xff]  ;;  %v489_v35 = vpack.c.bf16 %v473_v30, %v473_v30  ;;  %v476_v36 = vld [vmem:[%s2362_s11 + $0x40] sm:$0xff]  ;;  %v490_v37 = vpack.c.bf16 %v474_v32, %v474_v32  ;;  %v477_v38 = vld [vmem:[%s2362_s11 + $0x48] sm:$0xff] }
  0x1d   : > { %429 = vst.msk [vmem:[#allocation2 + $0x5c] sm:$0xf] %vm394_vm0, %v2191_v0  ;;  %v491_v39 = vpack.c.bf16 %v475_v34, %v475_v34  ;;  %v478_v40 = vld [vmem:[%s2362_s11 + $0x50] sm:$0xff]  ;;  %v492_v41 = vpack.c.bf16 %v476_v36, %v476_v36  ;;  %v479_v42 = vld [vmem:[%s2362_s11 + $0x58] sm:$0xff]  ;;  %v493_v43 = vpack.c.bf16 %v477_v38, %v477_v38  ;;  %v480_v44 = vld [vmem:[%s2362_s11 + $0x60] sm:$0xff] }
  0x1e   : > { %434 = vst.msk [vmem:[#allocation2 + $0x68] sm:$0xf] %vm394_vm0, %v2191_v0  ;;  %v494_v45 = vpack.c.bf16 %v478_v40, %v478_v40  ;;  %v481_v46 = vld [vmem:[%s2362_s11 + $0x68] sm:$0xff]  ;;  %v495_v47 = vpack.c.bf16 %v479_v42, %v479_v42  ;;  %v482_v48 = vld [vmem:[%s2362_s11 + $0x70] sm:$0xff]  ;;  %v496_v49 = vpack.c.bf16 %v480_v44, %v480_v44  ;;  %v483_v50 = vld [vmem:[%s2362_s11 + $0x78] sm:$0xff] }
  0x1f   : > { %435 = vst.msk [vmem:[#allocation2 + $0x6c] sm:$0xf] %vm394_vm0, %v2191_v0  ;;  %v497_v51 = vpack.c.bf16 %v481_v46, %v481_v46  ;;  %v498_v52 = vpack.c.bf16 %v482_v48, %v482_v48  ;;  %v499_v53 = vpack.c.bf16 %v483_v50, %v483_v50 }
  0x20   : > { %436 = vst.msk [vmem:[#allocation2 + $0x70] sm:$0xf] %vm394_vm0, %v2191_v0 }
  0x21   : > { %441 = vst.msk [vmem:[#allocation2 + $0x7c] sm:$0xf] %vm394_vm0, %v2191_v0 }
  0x22   : > { %442 = vst.msk [vmem:[#allocation2 + $0x80] sm:$0xf] %vm394_vm0, %v2191_v0 }
  0x23   : > { %443 = vst.msk [vmem:[#allocation2 + $0x84] sm:$0xf] %vm394_vm0, %v2191_v0 }
  0x24   : > { %448 = vst.msk [vmem:[#allocation2 + $0x90] sm:$0xf] %vm394_vm0, %v2191_v0 }
  0x25   : > { %449 = vst.msk [vmem:[#allocation2 + $0x94] sm:$0xf] %vm394_vm0, %v2191_v0 }
  0x26   : > { %450 = vst.msk [vmem:[#allocation2 + $0x98] sm:$0xf] %vm394_vm0, %v2191_v0 }
  0x27   : > { %455 = vst.msk [vmem:[#allocation2 + $0xa4] sm:$0xf] %vm394_vm0, %v2191_v0 }
  0x28   : > { %456 = vst.msk [vmem:[#allocation2 + $0xa8] sm:$0xf] %vm394_vm0, %v2191_v0 }
  0x29   : > { %457 = vst.msk [vmem:[#allocation2 + $0xac] sm:$0xf] %vm394_vm0, %v2191_v0 }
  0x2a   : > { %462 = vst.msk [vmem:[#allocation2 + $0xb8] sm:$0xf] %vm394_vm0, %v2191_v0 }
  0x2b   : > { %463 = vst.msk [vmem:[#allocation2 + $0xbc] sm:$0xf] %vm394_vm0, %v2191_v0 }
  0x2c   : > { %464 = vst.msk [vmem:[#allocation2 + $0xc0] sm:$0xf] %vm394_vm0, %v2191_v0 }
  0x2d   : > { %404 = vst [vmem:[#allocation2 + $0x10] sm:$0x1] %v403_v5 }
  0x2e   : > { %411 = vst [vmem:[#allocation2 + $0x24] sm:$0x1] %v410_v7 }
  0x2f   : > { %418 = vst [vmem:[#allocation2 + $0x38] sm:$0x1] %v417_v9 }
  0x30   : > { %425 = vst [vmem:[#allocation2 + $0x4c] sm:$0x1] %v424_v11 }
  0x31   : > { %432 = vst [vmem:[#allocation2 + $0x60] sm:$0x1] %v431_v13 }
  0x32   : > { %439 = vst [vmem:[#allocation2 + $0x74] sm:$0x1] %v438_v15 }
  0x33   : > { %446 = vst [vmem:[#allocation2 + $0x88] sm:$0x1] %v445_v17 }
  0x34   : > { %453 = vst [vmem:[#allocation2 + $0x9c] sm:$0x1] %v452_v20 }
  0x35   : > { %460 = vst [vmem:[#allocation2 + $0xb0] sm:$0x1] %v459_v22 }
  0x36   : > { %467 = vst [vmem:[#allocation2 + $0xc4] sm:$0x1] %v466_v24 }
  0x37   : > { %501 = vst.msk [vmem:[#allocation2 + $0x1c] sm:$0xf] %vm394_vm0, %v484_v25 }
  0x38   : > { %502 = vst.msk [vmem:[#allocation2 + $0x20] sm:$0xf] %vm394_vm0, %v485_v27 }
  0x39   : > { %503 = vst.msk [vmem:[#allocation2 + $0x30] sm:$0xf] %vm394_vm0, %v486_v29 }
  0x3a   : > { %504 = vst.msk [vmem:[#allocation2 + $0x34] sm:$0xf] %vm394_vm0, %v487_v31 }
  0x3b   : > { %505 = vst.msk [vmem:[#allocation2 + $0x44] sm:$0xf] %vm394_vm0, %v488_v33 }
  0x3c   : > { %506 = vst.msk [vmem:[#allocation2 + $0x48] sm:$0xf] %vm394_vm0, %v489_v35 }
  0x3d   : > { %507 = vst.msk [vmem:[#allocation2 + $0x58] sm:$0xf] %vm394_vm0, %v490_v37 }
  0x3e   : > { %508 = vst.msk [vmem:[#allocation2 + $0x5c] sm:$0xf] %vm394_vm0, %v491_v39 }
  0x3f   : > { %509 = vst.msk [vmem:[#allocation2 + $0x6c] sm:$0xf] %vm394_vm0, %v492_v41 }
  0x40   : > { %510 = vst.msk [vmem:[#allocation2 + $0x70] sm:$0xf] %vm394_vm0, %v493_v43 }
  0x41   : > { %511 = vst.msk [vmem:[#allocation2 + $0x80] sm:$0xf] %vm394_vm0, %v494_v45 }
  0x42   : > { %512 = vst.msk [vmem:[#allocation2 + $0x84] sm:$0xf] %vm394_vm0, %v495_v47  ;;  %520 = sbr.rel (%p1957_p10) target bundleno = 76 (0x4c), region = 44 }
  0x43   : > { %513 = vst.msk [vmem:[#allocation2 + $0x94] sm:$0xf] %vm394_vm0, %v496_v49 }
  0x44   : > { %514 = vst.msk [vmem:[#allocation2 + $0x98] sm:$0xf] %vm394_vm0, %v497_v51 }
  0x45   : > { %515 = vst.msk [vmem:[#allocation2 + $0xa8] sm:$0xf] %vm394_vm0, %v498_v52 }
  0x46   : > { %516 = vst.msk [vmem:[#allocation2 + $0xac] sm:$0xf] %vm394_vm0, %v499_v53 }
  0x47   : > { %v521_v54 = vld [vmem:[%s2300_s17] sm:$0xff]  ;;  %v522_v55 = vld [vmem:[%s2300_s17 + $0x8] sm:$0xff] }
  0x48   : > { %v523_v56 = vpack.c.bf16 %v521_v54, %v521_v54  ;;  %v524_v57 = vpack.c.bf16 %v522_v55, %v522_v55 }
  0x4a   : > { %525 = vst.msk [vmem:[#allocation2 + $0x8] sm:$0xf] %vm394_vm0, %v523_v56 }
  0x4b   : > { %526 = vst.msk [vmem:[#allocation2 + $0xc] sm:$0xf] %vm394_vm0, %v524_v57 }
  0x4c PF: > { %p1959_p11 = scmp.ge.s32.totalorder %s2273_s7, 16 }
  0x4e   : > { %532 = sbr.rel (%p1959_p11) target bundleno = 88 (0x58), region = 48 }
  0x53   : > { %v533_v58 = vld [vmem:[%s2314_s8] sm:$0xff]  ;;  %v534_v59 = vld [vmem:[%s2314_s8 + $0x8] sm:$0xff] }
  0x54   : > { %v535_v60 = vpack.c.bf16 %v533_v58, %v533_v58  ;;  %v536_v61 = vpack.c.bf16 %v534_v59, %v534_v59 }
  0x56   : > { %538 = vst.msk [vmem:[#allocation2 + $0xbc] sm:$0xf] %vm394_vm0, %v535_v60 }
  0x57   : > { %539 = vst.msk [vmem:[#allocation2 + $0xc0] sm:$0xf] %vm394_vm0, %v536_v61 }
  0x58 PF: > { %v1968_v62 = vld [vmem:[%s2911_s3 + $0x2] sm:$0x3]  ;;  %vm826_vm4 = vcmask 1041408   ;;  %v2421_v63 = vld [vmem:[#allocation2 + $0x30] sm:$0xff]  ;;  %vm801_vm5 = vcmask 31744   ;;  %v2424_v1 = vld [vmem:[#allocation2 + $0x58] sm:$0xff] }
  0x59   : > { %v828_v0 = vsel %vm826_vm4, %v1968_v62, 0  ;;  %v2426_v2 = vld [vmem:[#allocation2 + $0x80] sm:$0xff]  ;;  %v2096_v5 = vld [vmem:[#allocation2 + $0x8] sm:$0xff]  ;;  %vm580_vm6 = vsmask.f32 4368  ;;  %v2477_v46 = vld [vmem:[#allocation2 + $0x94] sm:$0xff] }
  0x5a   : > { %v2017_v3 = vld [vmem:[%s2911_s3 + $0x4] sm:$0x3]  ;;  %2106 = vmatpush.bf16.msra.mxu1 %v828_v0  ;;  %2107 = vmatpush.bf16.msra.mxu2 %v828_v0  ;;  %v2027_v6 = vld [vmem:[%s2911_s3 + $0x6] sm:$0x3]  ;;  %v758_v7 = vld [vmem:[%s2911_s3] sm:$0x3] }
  0x5b   : > { %v1145_v4 = vsel %vm826_vm4, %v2017_v3, 0  ;;  %2108 = vmatpush.bf16.msra.mxu3 %v828_v0  ;;  %837 = vmatpush.bf16.msra.mxu0 %v828_v0  ;;  %v1243_v8 = vsel %vm826_vm4, %v2027_v6, 0  ;;  %v2036_v9 = vld [vmem:[%s2911_s3 + $0x8] sm:$0x3]  ;;  %v928_v10 = vsel %vm826_vm4, %v758_v7, 0  ;;  %v2473_v39 = vld [vmem:[#allocation2 + $0x6c] sm:$0xff]  ;;  %vm2483_vm9 = vmor %vm400_vm2, %vm580_vm6 }
  0x5c   : > { %v1321_v11 = vsel %vm826_vm4, %v2036_v9, 0  ;;  %v541_v12 = vld [vmem:[#allocation2 + $0x8] sm:$0xf]  ;;  %v542_v13 = vld [vmem:[#allocation2 + $0xc] sm:$0xf]  ;;  %v2479_v47 = vld [vmem:[#allocation2 + $0x1c] sm:$0xff] }
  0x5d   : > { %2003 = vmatmul.msk.bf16.vlgmr.msra.gmra.mxu1 %vm801_vm5, %v2421_v63  ;;  %2005 = vmatmul.msk.bf16.vlgmr.msra.gmra.mxu2 %vm801_vm5, %v2424_v1  ;;  %v588_v14 = vshrl.u32 %v541_v12, 16  ;;  %v591_v15 = vshll.u32 %v541_v12, 16  ;;  %v597_v16 = vshrl.u32 %v542_v13, 16  ;;  %v600_v17 = vshll.u32 %v542_v13, 16  ;;  %v540_v18 = vld [vmem:[#allocation2 + $0x4] sm:$0x8] }
  0x5e   : > { %1154 = vmatpush.bf16.msrb.mxu2 %v1145_v4  ;;  %2007 = vmatmul.msk.bf16.vlgmr.msra.gmra.mxu3 %vm801_vm5, %v2426_v2  ;;  %v2059_v21 = vld [vmem:[%s2911_s3 + $0xc] sm:$0x3]  ;;  %v2068_v22 = vld [vmem:[%s2911_s3 + $0xe] sm:$0x3]  ;;  %v2457_v25 = vld [vmem:[#allocation2 + $0x1c] sm:$0xf] }
  0x5f   : > { %1252 = vmatpush.bf16.msrb.mxu3 %v1243_v8  ;;  %2001 = vmatmul.msk.bf16.vlgmr.msra.gmra.mxu0 %vm801_vm5, %v2096_v5  ;;  %v982_v19 = vrot.slane %v588_v14, 4  ;;  %v983_v20 = vrot.slane %v591_v15, 5  ;;  %v986_v23 = vrot.slane %v600_v17, 5  ;;  %v988_v24 = vrot.slane %v597_v16, 4  ;;  %v2459_v26 = vld [vmem:[#allocation2 + $0x20] sm:$0xf] }
  0x60   : > { %937 = vmatpush.bf16.msrb.mxu1 %v928_v10  ;;  %1330 = vmatpush.bf16.msrb.mxu0 %v1321_v11  ;;  %v583_v27 = vshrl.u32 %v540_v18, 16  ;;  %v570_v28 = vld [vmem:[#allocation2 + $0x10] sm:$0x1]  ;;  %v2049_v29 = vld [vmem:[%s2911_s3 + $0xa] sm:$0x3]  ;;  %v590_v30 = vrot.slane %v588_v14, 7 }
  0x61   : > { %v599_v31 = vrot.slane %v597_v16, 7  ;;  %v1509_v32 = vsel %vm826_vm4, %v2059_v21, 0  ;;  %v1587_v33 = vsel %vm826_vm4, %v2068_v22, 0  ;;  %v2081_v34 = vld [vmem:[%s2911_s3 + $0x10] sm:$0x3]  ;;  %v610_v36 = vshrl.u32 %v2457_v25, 16 }
  0x62   : > { %v543_v35 = vld [vmem:[#allocation2 + $0x18] sm:$0x8]  ;;  %v619_v37 = vshrl.u32 %v2459_v26, 16  ;;  %1518 = vmatpush.bf16.msra.mxu2 %v1509_v32  ;;  %v2471_v38 = vld [vmem:[#allocation2 + $0x44] sm:$0xff]  ;;  %v984_v40 = vor.u32 %v983_v20, %v982_v19  ;;  %v989_v41 = vor.u32 %v988_v24, %v986_v23  ;;  %v992_v42 = vshll.u32 %v570_v28, 16 }
  0x63   : > { %1596 = vmatpush.bf16.msra.mxu3 %v1587_v33  ;;  %v1411_v43 = vsel %vm826_vm4, %v2049_v29, 0  ;;  %v1960_v44 = vrot.slane %v583_v27, 11  ;;  %vm979_vm7 = vsmask.f32 3328  ;;  %vm980_vm8 = vsmask.f32 7440 }
  0x64   : > { %1420 = vmatpush.bf16.msra.mxu1 %v1411_v43  ;;  %v1677_v45 = vsel %vm826_vm4, %v2081_v34, 0  ;;  %v593_v48 = vor.u32 %v591_v15, %v590_v30  ;;  %v595_v49 = vrot.slane %v590_v30, 4  ;;  %v602_v50 = vor.u32 %v600_v17, %v599_v31  ;;  %vm2495_vm10 = vmor %vm979_vm7, %vm980_vm8  ;;  %v547_v10 = vld [vmem:[#allocation2 + $0x30] sm:$0xf]  ;;  %v548_v11 = vld [vmem:[#allocation2 + $0x34] sm:$0xf] }
  0x65   : > { %v605_v51 = vshrl.u32 %v543_v35, 16  ;;  %1686 = vmatpush.bf16.msra.mxu0 %v1677_v45  ;;  %v612_v53 = vrot.slane %v610_v36, 7  ;;  %v613_v54 = vshll.u32 %v2457_v25, 16  ;;  %v621_v55 = vrot.slane %v619_v37, 7  ;;  %v571_v16 = vld [vmem:[#allocation2 + $0x24] sm:$0x1] }
  0x66   : > { %v622_v56 = vshll.u32 %v2459_v26, 16  ;;  %v985_v57 = vrot.slane %v984_v40, 4  ;;  %v990_v58 = vrot.slane %v989_v41, 4  ;;  %v994_v59 = vrot.slane %v992_v42, 5  ;;  %v546_v21 = vld [vmem:[#allocation2 + $0x2c] sm:$0x8] }
  0x67   : > { %v594_v61 = vsel %vm2483_vm9, %v1960_v44, %v593_v48  ;;  %v603_v62 = vsel %vm2483_vm9, %v595_v49, %v602_v50  ;;  %v1961_v0 = vrot.slane %v605_v51, 11  ;;  %v615_v3 = vor.u32 %v613_v54, %v612_v53 }
  0x68   : > { %v617_v4 = vrot.slane %v612_v53, 4  ;;  %v624_v5 = vor.u32 %v622_v56, %v621_v55  ;;  %v987_v6 = vsel %vm2495_vm10, %v985_v57, %v986_v23  ;;  %v995_v7 = vsel %vm2495_vm10, %v990_v58, %v994_v59  ;;  %v550_v53 = vld [vmem:[#allocation2 + $0x44] sm:$0xf] }
  0x69   : > { %v879_v8 = vunpack.c.l.b16 %v594_v61  ;;  %v880_v9 = vunpack.c.l.b16 %v603_v62  ;;  %v1096_v12 = vunpack.c.l.b16 %v987_v6  ;;  %v1097_v13 = vunpack.c.l.b16 %v995_v7 }
  0x6a   : > { %v616_v14 = vsel %vm2483_vm9, %v1961_v0, %v615_v3  ;;  %v625_v15 = vsel %vm2483_vm9, %v617_v4, %v624_v5  ;;  %v996_v17 = vrot.slane %v610_v36, 4  ;;  %v997_v18 = vrot.slane %v613_v54, 5  ;;  %v551_v54 = vld [vmem:[#allocation2 + $0x48] sm:$0xf]  ;;  %v572_v0 = vld [vmem:[#allocation2 + $0x38] sm:$0x1] }
  0x6b   : > { %v1000_v19 = vrot.slane %v622_v56, 5  ;;  %v1002_v20 = vrot.slane %v619_v37, 4  ;;  %v632_v22 = vshrl.u32 %v547_v10, 16  ;;  %v641_v23 = vshrl.u32 %v548_v11, 16  ;;  %v549_v3 = vld [vmem:[#allocation2 + $0x40] sm:$0x8] }
  0x6c   : > { %v881_v24 = vunpack.c.l.b16 %v616_v14  ;;  %v882_v25 = vunpack.c.l.b16 %v625_v15  ;;  %v895_v26 = vpack.c.b16 %v880_v9, %v879_v8  ;;  %v1112_v27 = vpack.c.b16 %v1097_v13, %v1096_v12 }
  0x6d   : > { %2004 = vmatmul.msk.bf16.gmra.mxu1 %vm801_vm5, %v2471_v38  ;;  %2006 = vmatmul.msk.bf16.gmra.mxu2 %vm801_vm5, %v2473_v39  ;;  %v998_v28 = vor.u32 %v997_v18, %v996_v17  ;;  %v1006_v29 = vshll.u32 %v571_v16, 16  ;;  %v627_v30 = vshrl.u32 %v546_v21, 16  ;;  %v635_v31 = vshll.u32 %v547_v10, 16 }
  0x6e   : > { %2008 = vmatmul.msk.bf16.gmra.mxu3 %vm801_vm5, %v2477_v46  ;;  %v1003_v32 = vor.u32 %v1002_v20, %v1000_v19  ;;  %v634_v33 = vrot.slane %v632_v22, 7  ;;  %v643_v34 = vrot.slane %v641_v23, 7  ;;  %v644_v35 = vshll.u32 %v548_v11, 16 }
  0x6f   : > { %2002 = vmatmul.msk.bf16.gmra.mxu0 %vm801_vm5, %v2479_v47  ;;  %v896_v40 = vpack.c.b16 %v882_v25, %v881_v24  ;;  %v999_v36 = vrot.slane %v998_v28, 4  ;;  %v1008_v41 = vrot.slane %v1006_v29, 5  ;;  %v1962_v42 = vrot.slane %v627_v30, 11  ;;  %v554_v28 = vld [vmem:[#allocation2 + $0x5c] sm:$0xf] }
  0x70   : > { %v1004_v37 = vrot.slane %v1003_v32, 4  ;;  %v637_v43 = vor.u32 %v635_v31, %v634_v33  ;;  %v639_v44 = vrot.slane %v634_v33, 4  ;;  %v646_v45 = vor.u32 %v644_v35, %v643_v34 }
  0x71   : > { %v1001_v48 = vsel %vm2495_vm10, %v999_v36, %v1000_v19  ;;  %v1010_v59 = vrot.slane %v632_v22, 4  ;;  %v1014_v61 = vrot.slane %v644_v35, 5  ;;  %v1016_v62 = vrot.slane %v641_v23, 4  ;;  %v573_v36 = vld [vmem:[#allocation2 + $0x4c] sm:$0x1] }
  0x72   : > { %v1009_v49 = vsel %vm2495_vm10, %v1004_v37, %v1008_v41  ;;  %v638_v50 = vsel %vm2483_vm9, %v1962_v42, %v637_v43  ;;  %v647_v51 = vsel %vm2483_vm9, %v639_v44, %v646_v45  ;;  %v1098_v55 = vunpack.c.l.b16 %v1001_v48  ;;  %v552_v41 = vld [vmem:[#allocation2 + $0x54] sm:$0x8] }
  0x73   : > { %v1099_v56 = vunpack.c.l.b16 %v1009_v49  ;;  %v883_v57 = vunpack.c.l.b16 %v638_v50  ;;  %v884_v58 = vunpack.c.l.b16 %v647_v51  ;;  %v654_v4 = vshrl.u32 %v550_v53, 16 }
  0x74   : > { %v663_v5 = vshrl.u32 %v551_v54, 16  ;;  %v1017_v9 = vor.u32 %v1016_v62, %v1014_v61  ;;  %v1020_v10 = vshll.u32 %v572_v0, 16  ;;  %v649_v11 = vshrl.u32 %v549_v3, 16 }
  0x75   : > { %v2528_v6 = vpack.c.b16 %v1099_v56, %v1098_v55  ;;  %v2530_v7 = vpack.c.b16 %v884_v58, %v883_v57  ;;  %v656_v12 = vrot.slane %v654_v4, 7  ;;  %v657_v13 = vshll.u32 %v550_v53, 16 }
  0x76   : > { %v665_v14 = vrot.slane %v663_v5, 7  ;;  %v666_v15 = vshll.u32 %v551_v54, 16  ;;  %v1022_v17 = vrot.slane %v1020_v10, 5  ;;  %v1963_v18 = vrot.slane %v649_v11, 11 }
  0x77   : > { %v1018_v19 = vrot.slane %v1017_v9, 4  ;;  %v659_v20 = vor.u32 %v657_v13, %v656_v12  ;;  %v661_v21 = vrot.slane %v656_v12, 4  ;;  %v1024_v33 = vrot.slane %v654_v4, 4 }
  0x78   : > { %v668_v22 = vor.u32 %v666_v15, %v665_v14  ;;  %v1025_v34 = vrot.slane %v657_v13, 5  ;;  %v1028_v35 = vrot.slane %v666_v15, 5  ;;  %v685_v37 = vshrl.u32 %v554_v28, 16  ;;  %v557_v13 = vld [vmem:[#allocation2 + $0x70] sm:$0xf] }
  0x79   : > { %v1023_v24 = vsel %vm2495_vm10, %v1018_v19, %v1022_v17  ;;  %v660_v25 = vsel %vm2483_vm9, %v1963_v18, %v659_v20  ;;  %v1034_v49 = vshll.u32 %v573_v36, 16  ;;  %v671_v50 = vshrl.u32 %v552_v41, 16  ;;  %v555_v19 = vld [vmem:[#allocation2 + $0x68] sm:$0x8] }
  0x7a   : > { %v1101_v30 = vunpack.c.l.b16 %v1023_v24  ;;  %v1026_v45 = vor.u32 %v1025_v34, %v1024_v33  ;;  %v687_v54 = vrot.slane %v685_v37, 7  ;;  %v688_v55 = vshll.u32 %v554_v28, 16 }
  0x7b   : > { %v1036_v58 = vrot.slane %v1034_v49, 5  ;;  %v1044_v12 = vrot.slane %v685_v37, 4 }
  0x7c   : > { %v1027_v56 = vrot.slane %v1026_v45, 4  ;;  %v690_v62 = vor.u32 %v688_v55, %v687_v54  ;;  %v1042_v11 = vrot.slane %v688_v55, 5  ;;  %v559_v45 = vld [vmem:[#allocation2 + $0x80] sm:$0xf] }
  0x7d   : > { %2009 = vmatmul.msk.bf16.vlgmr.msrb.gmra.mxu1 %vm801_vm5, %v895_v26  ;;  %2018 = vmatmul.msk.bf16.vlgmr.msrb.gmra.mxu2 %vm801_vm5, %v1112_v27  ;;  %v669_v26 = vsel %vm2483_vm9, %v661_v21, %v668_v22  ;;  %v553_v27 = vld [vmem:[#allocation2 + $0x58] sm:$0xf]  ;;  %v707_v21 = vshrl.u32 %v557_v13, 16 }
  0x7e   : > { %2028 = vmatmul.msk.bf16.vlgmr.msrb.gmra.mxu3 %vm801_vm5, %v896_v40  ;;  %v886_v32 = vunpack.c.l.b16 %v669_v26  ;;  %v676_v42 = vshrl.u32 %v553_v27, 16  ;;  %v679_v53 = vshll.u32 %v553_v27, 16  ;;  %v1029_v0 = vsel %vm2495_vm10, %v1027_v56, %v1028_v35 }
  0x7f   : > { %2041 = vmatmul.msk.bf16.vlgmr.msrb.gmra.mxu0 %vm801_vm5, %v2479_v47  ;;  %v1011_v47 = vrot.slane %v635_v31, 5  ;;  %v885_v31 = vunpack.c.l.b16 %v660_v25  ;;  %v1102_v14 = vunpack.c.l.b16 %v1029_v0  ;;  %v693_v27 = vshrl.u32 %v555_v19, 16 }
  0x80   : > { %v678_v51 = vrot.slane %v676_v42, 7  ;;  %v1038_v9 = vrot.slane %v676_v42, 4  ;;  %v1039_v10 = vrot.slane %v679_v53, 5 }
  0x81   : > { %v1012_v8 = vor.u32 %v1011_v47, %v1010_v59  ;;  %v2549_v44 = vpack.c.b16 %v886_v32, %v885_v31  ;;  %v1964_v59 = vrot.slane %v671_v50, 11  ;;  %v710_v31 = vshll.u32 %v557_v13, 16 }
  0x82   : > { %v681_v47 = vor.u32 %v679_v53, %v678_v51  ;;  %v1040_v22 = vor.u32 %v1039_v10, %v1038_v9 }
  0x83   : > { %v1013_v16 = vrot.slane %v1012_v8, 4  ;;  %v556_v8 = vld [vmem:[#allocation2 + $0x6c] sm:$0xf]  ;;  %v1056_v56 = vrot.slane %v710_v31, 5 }
  0x84   : > { %v682_v4 = vsel %vm2483_vm9, %v1964_v59, %v681_v47  ;;  %v698_v20 = vshrl.u32 %v556_v8, 16  ;;  %v1041_v32 = vrot.slane %v1040_v22, 4  ;;  %v558_v59 = vld [vmem:[#allocation2 + $0x7c] sm:$0x8]  ;;  %v720_v47 = vshrl.u32 %v559_v45, 16 }
  0x85   : > { %v1015_v23 = vsel %vm2495_vm10, %v1013_v16, %v1014_v61  ;;  %v683_v61 = vrot.slane %v678_v51, 4  ;;  %v574_v16 = vld [vmem:[#allocation2 + $0x60] sm:$0x1]  ;;  %v887_v17 = vunpack.c.l.b16 %v682_v4  ;;  %v715_v9 = vshrl.u32 %v558_v59, 16 }
  0x86   : > { %v1100_v29 = vunpack.c.l.b16 %v1015_v23  ;;  %v1045_v23 = vor.u32 %v1044_v12, %v1042_v11  ;;  %v1048_v24 = vshll.u32 %v574_v16, 16  ;;  %v700_v28 = vrot.slane %v698_v20, 7 }
  0x87   : > { %v1043_v42 = vsel %vm2495_vm10, %v1041_v32, %v1042_v11  ;;  %v1052_v54 = vrot.slane %v698_v20, 4  ;;  %v722_v10 = vrot.slane %v720_v47, 7  ;;  %v723_v11 = vshll.u32 %v559_v45, 16 }
  0x88   : > { %v2547_v43 = vpack.c.b16 %v1101_v30, %v1100_v29  ;;  %v701_v29 = vshll.u32 %v556_v8, 16  ;;  %v709_v30 = vrot.slane %v707_v21, 7  ;;  %v1046_v33 = vrot.slane %v1045_v23, 4 }
  0x89   : > { %v1050_v34 = vrot.slane %v1048_v24, 5  ;;  %v705_v36 = vrot.slane %v700_v28, 4  ;;  %v1104_v49 = vunpack.c.l.b16 %v1043_v42  ;;  %v725_v19 = vor.u32 %v723_v11, %v722_v10  ;;  %v561_v42 = vld [vmem:[#allocation2 + $0x90] sm:$0x8] }
  0x8a   : > { %v712_v41 = vor.u32 %v710_v31, %v709_v30  ;;  %v1053_v55 = vrot.slane %v701_v29, 5  ;;  %v727_v20 = vrot.slane %v722_v10, 4 }
  0x8b   : > { %v1051_v37 = vsel %vm2495_vm10, %v1046_v33, %v1050_v34  ;;  %v1066_v34 = vrot.slane %v720_v47, 4 }
  0x8c   : > { %v1105_v50 = vunpack.c.l.b16 %v1051_v37  ;;  %v713_v53 = vsel %vm2483_vm9, %v705_v36, %v712_v41  ;;  %v1054_v4 = vor.u32 %v1053_v55, %v1052_v54  ;;  %v576_v41 = vld [vmem:[#allocation2 + $0x88] sm:$0x1]  ;;  %v737_v54 = vshrl.u32 %v561_v42, 16 }
  0x8d   : > { %2010 = vmatmul.msk.bf16.gmra.mxu1 %vm801_vm5, %v896_v40  ;;  %2019 = vmatmul.msk.bf16.gmra.mxu2 %vm801_vm5, %v2528_v6  ;;  %v1030_v40 = vrot.slane %v663_v5, 4  ;;  %v691_v5 = vsel %vm2483_vm9, %v683_v61, %v690_v62  ;;  %v890_v0 = vunpack.c.l.b16 %v713_v53  ;;  %v1076_v53 = vshll.u32 %v576_v41, 16 }
  0x8e   : > { %2029 = vmatmul.msk.bf16.gmra.mxu3 %vm801_vm5, %v2530_v7  ;;  %v888_v18 = vunpack.c.l.b16 %v691_v5 }
  0x8f   : > { %2042 = vmatmul.msk.bf16.gmra.mxu0 %vm801_vm5, %v2421_v63  ;;  %v1031_v48 = vor.u32 %v1030_v40, %v1028_v35  ;;  %v1965_v35 = vrot.slane %v693_v27, 11  ;;  %v703_v40 = vor.u32 %v701_v29, %v700_v28  ;;  %v562_v28 = vld [vmem:[#allocation2 + $0x94] sm:$0xf]  ;;  %v563_v29 = vld [vmem:[#allocation2 + $0x98] sm:$0xf] }
  0x90   : > { %v2569_v26 = vpack.c.b16 %v888_v18, %v887_v17  ;;  %v1966_v18 = vrot.slane %v715_v9, 11  ;;  %v742_v37 = vshrl.u32 %v562_v28, 16  ;;  %v751_v45 = vshrl.u32 %v563_v29, 16 }
  0x91   : > { %v1032_v57 = vrot.slane %v1031_v48, 4  ;;  %v560_v48 = vld [vmem:[#allocation2 + $0x84] sm:$0xf]  ;;  %v704_v51 = vsel %vm2483_vm9, %v1965_v35, %v703_v40  ;;  %v1067_v35 = vrot.slane %v723_v11, 5 }
  0x92   : > { %v729_v61 = vshrl.u32 %v560_v48, 16  ;;  %v889_v62 = vunpack.c.l.b16 %v704_v51  ;;  %v732_v13 = vshll.u32 %v560_v48, 16  ;;  %v726_v24 = vsel %vm2483_vm9, %v1966_v18, %v725_v19 }
  0x93   : > { %v1037_v3 = vsel %vm2495_vm10, %v1032_v57, %v1036_v58  ;;  %v1058_v57 = vrot.slane %v707_v21, 4  ;;  %v575_v58 = vld [vmem:[#allocation2 + $0x74] sm:$0x1]  ;;  %v891_v32 = vunpack.c.l.b16 %v726_v24  ;;  %v744_v55 = vrot.slane %v742_v37, 7  ;;  %v564_v24 = vld [vmem:[#allocation2 + $0xa4] sm:$0x8] }
  0x94   : > { %v1103_v15 = vunpack.c.l.b16 %v1037_v3  ;;  %v2587_v3 = vpack.c.b16 %v1105_v50, %v1104_v49  ;;  %v1062_v8 = vshll.u32 %v575_v58, 16  ;;  %v731_v12 = vrot.slane %v729_v61, 7 }
  0x95   : > { %v1059_v5 = vor.u32 %v1058_v57, %v1056_v56  ;;  %v1070_v40 = vrot.slane %v732_v13, 5  ;;  %v1072_v36 = vrot.slane %v729_v61, 4  ;;  %v1068_v50 = vor.u32 %v1067_v35, %v1066_v34 }
  0x96   : > { %v2567_v25 = vpack.c.b16 %v1103_v15, %v1102_v14  ;;  %v2589_v14 = vpack.c.b16 %v890_v0, %v889_v62  ;;  %v1055_v15 = vrot.slane %v1054_v4, 4  ;;  %v1064_v17 = vrot.slane %v1062_v8, 5 }
  0x97   : > { %v1060_v16 = vrot.slane %v1059_v5, 4  ;;  %v734_v21 = vor.u32 %v732_v13, %v731_v12  ;;  %v1073_v51 = vor.u32 %v1072_v36, %v1070_v40  ;;  %v753_v57 = vrot.slane %v751_v45, 7  ;;  %v2627_v12 = vld [vmem:[#allocation2 + $0xa8] sm:$0xf]  ;;  %v2629_v13 = vld [vmem:[#allocation2 + $0xac] sm:$0xf] }
  0x98   : > { %v1057_v22 = vsel %vm2495_vm10, %v1055_v15, %v1056_v56  ;;  %v745_v56 = vshll.u32 %v562_v28, 16  ;;  %v754_v58 = vshll.u32 %v563_v29, 16  ;;  %v1069_v59 = vrot.slane %v1068_v50, 4 }
  0x99   : > { %v1065_v23 = vsel %vm2495_vm10, %v1060_v16, %v1064_v17  ;;  %v735_v27 = vsel %vm2483_vm9, %v727_v20, %v734_v21  ;;  %v1106_v30 = vunpack.c.l.b16 %v1057_v22  ;;  %v1074_v47 = vrot.slane %v1073_v51, 4 }
  0x9a   : > { %v1107_v31 = vunpack.c.l.b16 %v1065_v23  ;;  %v892_v33 = vunpack.c.l.b16 %v735_v27  ;;  %v1078_v61 = vrot.slane %v1076_v53, 5  ;;  %v1967_v62 = vrot.slane %v737_v54, 11  ;;  %v577_v23 = vld [vmem:[#allocation2 + $0x9c] sm:$0x1] }
  0x9b   : > { %v747_v0 = vor.u32 %v745_v56, %v744_v55  ;;  %v749_v4 = vrot.slane %v744_v55, 4  ;;  %v756_v5 = vor.u32 %v754_v58, %v753_v57  ;;  %v1071_v8 = vsel %vm2495_vm10, %v1069_v59, %v1070_v40 }
  0x9c   : > { %v2607_v48 = vpack.c.b16 %v1107_v31, %v1106_v30  ;;  %v2609_v49 = vpack.c.b16 %v892_v33, %v891_v32  ;;  %v1079_v9 = vsel %vm2495_vm10, %v1074_v47, %v1078_v61  ;;  %v1108_v15 = vunpack.c.l.b16 %v1071_v8 }
  0x9d   : > { %2011 = vmatmul.msk.bf16.gmra.mxu1 %vm801_vm5, %v2530_v7  ;;  %2020 = vmatmul.msk.bf16.gmra.mxu2 %vm801_vm5, %v2547_v43  ;;  %v748_v10 = vsel %vm2483_vm9, %v1967_v62, %v747_v0  ;;  %v757_v11 = vsel %vm2483_vm9, %v749_v4, %v756_v5  ;;  %v1109_v16 = vunpack.c.l.b16 %v1079_v9  ;;  %v1080_v19 = vrot.slane %v742_v37, 4 }
  0x9e   : > { %2030 = vmatmul.msk.bf16.gmra.mxu3 %vm801_vm5, %v2549_v44  ;;  %v893_v17 = vunpack.c.l.b16 %v748_v10  ;;  %v894_v18 = vunpack.c.l.b16 %v757_v11  ;;  %v1081_v20 = vrot.slane %v745_v56, 5  ;;  %v1084_v21 = vrot.slane %v754_v58, 5 }
  0x9f   : > { %2043 = vmatmul.msk.bf16.gmra.mxu0 %vm801_vm5, %v2471_v38  ;;  %v1086_v22 = vrot.slane %v751_v45, 4  ;;  %v1218_v27 = vshrl.u32 %v2627_v12, 16  ;;  %v1227_v28 = vshrl.u32 %v2629_v13, 16  ;;  %v2633_v29 = vpack.c.b16 %v1109_v16, %v1108_v15 }
  0xa0   : > { %v2635_v30 = vpack.c.b16 %v894_v18, %v893_v17  ;;  %v1082_v32 = vor.u32 %v1081_v20, %v1080_v19  ;;  %v1090_v34 = vshll.u32 %v577_v23, 16  ;;  %v1213_v35 = vshrl.u32 %v564_v24, 16  ;;  %v2681_v19 = vld [vmem:[#allocation2 + $0xa8] sm:$0xff] }
  0xa1   : > { %v1087_v33 = vor.u32 %v1086_v22, %v1084_v21  ;;  %v1220_v36 = vrot.slane %v1218_v27, 7  ;;  %v1221_v41 = vshll.u32 %v2627_v12, 16  ;;  %v1229_v42 = vrot.slane %v1227_v28, 7 }
  0xa2   : > { %v1230_v37 = vshll.u32 %v2629_v13, 16  ;;  %v1083_v45 = vrot.slane %v1082_v32, 4  ;;  %v1092_v51 = vrot.slane %v1090_v34, 5  ;;  %v2026_v53 = vrot.slane %v1213_v35, 11 }
  0xa3   : > { %v1088_v50 = vrot.slane %v1087_v33, 4  ;;  %v1223_v54 = vor.u32 %v1221_v41, %v1220_v36  ;;  %v1225_v55 = vrot.slane %v1220_v36, 4 }
  0xa4   : > { %v1232_v56 = vor.u32 %v1230_v37, %v1229_v42  ;;  %v1085_v47 = vsel %vm2495_vm10, %v1083_v45, %v1084_v21 }
  0xa5   : > { %v1093_v61 = vsel %vm2495_vm10, %v1088_v50, %v1092_v51  ;;  %v1224_v0 = vsel %vm2483_vm9, %v2026_v53, %v1223_v54  ;;  %v1110_v5 = vunpack.c.l.b16 %v1085_v47 }
  0xa6   : > { %v1233_v4 = vsel %vm2483_vm9, %v1225_v55, %v1232_v56  ;;  %v1111_v8 = vunpack.c.l.b16 %v1093_v61  ;;  %v1236_v9 = vunpack.c.l.b16 %v1224_v0 }
  0xa7   : > { %v1237_v10 = vunpack.c.l.b16 %v1233_v4 }
  0xa8   : > { %v2675_v16 = vpack.c.b16 %v1111_v8, %v1110_v5 }
  0xa9   : > { %v2679_v18 = vpack.c.b16 %v1237_v10, %v1236_v9 }
  0xad   : > { %2012 = vmatmul.msk.bf16.gmra.mxu1 %vm801_vm5, %v2549_v44  ;;  %2021 = vmatmul.msk.bf16.gmra.mxu2 %vm801_vm5, %v2567_v25 }
  0xae   : > { %2031 = vmatmul.msk.bf16.gmra.mxu3 %vm801_vm5, %v2569_v26 }
  0xaf   : > { %2044 = vmatmul.msk.bf16.gmra.mxu0 %vm801_vm5, %v2424_v1 }
  0xbd   : > { %2013 = vmatmul.msk.bf16.gmra.mxu1 %vm801_vm5, %v2569_v26  ;;  %2022 = vmatmul.msk.bf16.gmra.mxu2 %vm801_vm5, %v2587_v3 }
  0xbe   : > { %2032 = vmatmul.msk.bf16.gmra.mxu3 %vm801_vm5, %v2589_v14 }
  0xbf   : > { %2045 = vmatmul.msk.bf16.gmra.mxu0 %vm801_vm5, %v2473_v39 }
  0xcd   : > { %2014 = vmatmul.msk.bf16.gmra.mxu1 %vm801_vm5, %v2589_v14  ;;  %2023 = vmatmul.msk.bf16.gmra.mxu2 %vm801_vm5, %v2607_v48 }
  0xce   : > { %2033 = vmatmul.msk.bf16.gmra.mxu3 %vm801_vm5, %v2609_v49 }
  0xcf   : > { %2046 = vmatmul.msk.bf16.gmra.mxu0 %vm801_vm5, %v2426_v2 }
  0xda   : > { %v2637_v31 = vpop.f32.mrf.mxu1 }
  0xdc   : > { %v839_v40 = vpop.f32.mrf.mxu0 }
  0xdd   : > { %2015 = vmatmul.msk.bf16.gmra.mxu1 %vm801_vm5, %v2609_v49  ;;  %2024 = vmatmul.msk.bf16.gmra.mxu2 %vm801_vm5, %v2633_v29 }
  0xde   : > { %2034 = vmatmul.msk.bf16.gmra.mxu3 %vm801_vm5, %v2635_v30 }
  0xdf   : > { %2047 = vmatmul.msk.bf16.gmra.mxu0 %vm801_vm5, %v2477_v46 }
  0xe0   : > { %v2657_v57 = vpop.f32.mrf.mxu2 }
  0xe1   : > { %v2659_v58 = vpop.f32.mrf.mxu3 }
  0xe2   : > { %v2661_v59 = vpop.f32.mrf.mxu1 }
  0xe4   : > { %v841_v62 = vpop.f32.mrf.mxu0 }
  0xe8   : > { %v2671_v11 = vpop.f32.mrf.mxu2 }
  0xe9   : > { %v2673_v15 = vpop.f32.mrf.mxu3 }
  0xea   : > { %v2677_v17 = vpop.f32.mrf.mxu1 }
  0xec   : > { %v844_v20 = vpop.f32.mrf.mxu0 }
  0xed   : > { %2016 = vmatmul.msk.bf16.gmra.mxu1 %vm801_vm5, %v2635_v30  ;;  %2025 = vmatmul.msk.bf16.gmra.mxu2 %vm801_vm5, %v2675_v16 }
  0xee   : > { %2035 = vmatmul.msk.bf16.gmra.mxu3 %vm801_vm5, %v2679_v18 }
  0xef   : > { %2048 = vmatmul.msk.bf16.gmra.mxu0 %vm801_vm5, %v2681_v19 }
  0xf0   : > { %v2691_v21 = vpop.f32.mrf.mxu2 }
  0xf1   : > { %v2693_v22 = vpop.f32.mrf.mxu3 }
  0xf2   : > { %v2695_v23 = vpop.f32.mrf.mxu1 }
  0xf4   : > { %v846_v24 = vpop.f32.mrf.mxu0 }
  0xf8   : > { %v2697_v32 = vpop.f32.mrf.mxu2 }
  0xf9   : > { %v2699_v33 = vpop.f32.mrf.mxu3 }
  0xfa   : > { %v939_v34 = vpop.f32.mrf.mxu1 }
  0xfb   : > { %v940_v35 = vadd.f32 %v939_v34, %v839_v40 }
  0xfc   : > { %v1332_v36 = vpop.f32.mrf.mxu0 }
  0xfd   : > { %2050 = vmatmul.msk.bf16.vlgmr.msra.gmra.mxu1 %vm801_vm5, %v2528_v6  ;;  %2060 = vmatmul.msk.bf16.vlgmr.msra.gmra.mxu2 %vm801_vm5, %v2530_v7 }
  0xfe   : > { %2073 = vmatmul.msk.bf16.vlgmr.msra.gmra.mxu3 %vm801_vm5, %v2421_v63 }
  0xff   : > { %2082 = vmatmul.msk.bf16.vlgmr.msra.gmra.mxu0 %vm801_vm5, %v2547_v43 }
 0x100   : > { %v1156_v42 = vpop.f32.mrf.mxu2 }
 0x101   : > { %v1196_v45 = vadd.f32 %v1156_v42, %v940_v35  ;;  %v1254_v50 = vpop.f32.mrf.mxu3 }
 0x102   : > { %v941_v51 = vpop.f32.mrf.mxu1 }
 0x103   : > { %v1294_v53 = vadd.f32 %v1254_v50, %v1196_v45  ;;  %v942_v54 = vadd.f32 %v941_v51, %v841_v62 }
 0x104   : > { %v1334_v40 = vpop.f32.mrf.mxu0 }
 0x105   : > { %v2709_v55 = vadd.f32 %v1332_v36, %v1294_v53 }
 0x108   : > { %v1158_v56 = vpop.f32.mrf.mxu2 }
 0x109   : > { %v1197_v6 = vadd.f32 %v1158_v56, %v942_v54  ;;  %v1256_v47 = vpop.f32.mrf.mxu3 }
 0x10a   : > { %v944_v61 = vpop.f32.mrf.mxu1 }
 0x10b   : > { %v1295_v7 = vadd.f32 %v1256_v47, %v1197_v6  ;;  %v945_v0 = vadd.f32 %v944_v61, %v844_v20 }
 0x10c   : > { %v1337_v4 = vpop.f32.mrf.mxu0 }
 0x10d   : > { %2051 = vmatmul.msk.bf16.gmra.mxu1 %vm801_vm5, %v2547_v43  ;;  %2061 = vmatmul.msk.bf16.gmra.mxu2 %vm801_vm5, %v2549_v44  ;;  %v2715_v63 = vadd.f32 %v1334_v40, %v1295_v7 }
 0x10e   : > { %2074 = vmatmul.msk.bf16.gmra.mxu3 %vm801_vm5, %v2471_v38 }
 0x10f   : > { %2083 = vmatmul.msk.bf16.gmra.mxu0 %vm801_vm5, %v2567_v25 }
 0x110   : > { %v1161_v62 = vpop.f32.mrf.mxu2 }
 0x111   : > { %v1198_v5 = vadd.f32 %v1161_v62, %v945_v0  ;;  %v1259_v8 = vpop.f32.mrf.mxu3 }
 0x112   : > { %v946_v9 = vpop.f32.mrf.mxu1 }
 0x113   : > { %v1296_v10 = vadd.f32 %v1259_v8, %v1198_v5  ;;  %v947_v20 = vadd.f32 %v946_v9, %v846_v24 }
 0x114   : > { %v1339_v34 = vpop.f32.mrf.mxu0 }
 0x115   : > { %v2721_v35 = vadd.f32 %v1337_v4, %v1296_v10 }
 0x118   : > { %v1163_v43 = vpop.f32.mrf.mxu2 }
 0x119   : > { %v1199_v36 = vadd.f32 %v1163_v43, %v947_v20  ;;  %v1261_v44 = vpop.f32.mrf.mxu3 }
 0x11a   : > { %v949_v42 = vpop.f32.mrf.mxu1 }
 0x11b   : > { %v1297_v45 = vadd.f32 %v1261_v44, %v1199_v36  ;;  %v950_v50 = vadd.f32 %v949_v42, %v2637_v31 }
 0x11c   : > { %v1342_v38 = vpop.f32.mrf.mxu0 }
 0x11d   : > { %2052 = vmatmul.msk.bf16.gmra.mxu1 %vm801_vm5, %v2567_v25  ;;  %2062 = vmatmul.msk.bf16.gmra.mxu2 %vm801_vm5, %v2569_v26  ;;  %v2728_v51 = vadd.f32 %v1339_v34, %v1297_v45 }
 0x11e   : > { %2075 = vmatmul.msk.bf16.gmra.mxu3 %vm801_vm5, %v2424_v1 }
 0x11f   : > { %2084 = vmatmul.msk.bf16.gmra.mxu0 %vm801_vm5, %v2587_v3 }
 0x120   : > { %v1166_v24 = vpop.f32.mrf.mxu2 }
 0x121   : > { %v1200_v53 = vadd.f32 %v1166_v24, %v950_v50  ;;  %v1264_v54 = vpop.f32.mrf.mxu3 }
 0x122   : > { %v951_v40 = vpop.f32.mrf.mxu1 }
 0x123   : > { %v1298_v31 = vadd.f32 %v1264_v54, %v1200_v53  ;;  %v952_v56 = vadd.f32 %v951_v40, %v2661_v59  ;;  %v1394_v40 = vrot.slane %v1227_v28, 4 }
 0x124   : > { %v1344_v6 = vpop.f32.mrf.mxu0 }
 0x125   : > { %v2735_v25 = vadd.f32 %v1342_v38, %v1298_v31 }
 0x128   : > { %v1168_v47 = vpop.f32.mrf.mxu2 }
 0x129   : > { %v1201_v26 = vadd.f32 %v1168_v47, %v952_v56  ;;  %v1266_v61 = vpop.f32.mrf.mxu3  ;;  %v578_v56 = vld [vmem:[#allocation2 + $0xb0] sm:$0x1] }
 0x12a   : > { %v954_v7 = vpop.f32.mrf.mxu1 }
 0x12b   : > { %v1299_v0 = vadd.f32 %v1266_v61, %v1201_v26  ;;  %v955_v1 = vadd.f32 %v954_v7, %v2677_v17 }
 0x12c   : > { %v1347_v4 = vpop.f32.mrf.mxu0 }
 0x12d   : > { %2053 = vmatmul.msk.bf16.gmra.mxu1 %vm801_vm5, %v2587_v3  ;;  %2063 = vmatmul.msk.bf16.gmra.mxu2 %vm801_vm5, %v2589_v14  ;;  %v2742_v62 = vadd.f32 %v1344_v6, %v1299_v0  ;;  %v1398_v0 = vshll.u32 %v578_v56, 16 }
 0x12e   : > { %2076 = vmatmul.msk.bf16.gmra.mxu3 %vm801_vm5, %v2473_v39 }
 0x12f   : > { %2085 = vmatmul.msk.bf16.gmra.mxu0 %vm801_vm5, %v2607_v48 }
 0x130   : > { %v1171_v59 = vpop.f32.mrf.mxu2 }
 0x131   : > { %v1202_v5 = vadd.f32 %v1171_v59, %v955_v1  ;;  %v1269_v8 = vpop.f32.mrf.mxu3 }
 0x132   : > { %v956_v9 = vpop.f32.mrf.mxu1 }
 0x133   : > { %v1300_v17 = vadd.f32 %v1269_v8, %v1202_v5  ;;  %v957_v10 = vadd.f32 %v956_v9, %v2695_v23  ;;  %v569_v5 = vld [vmem:[#allocation2 + $0xc0] sm:$0xf] }
 0x134   : > { %v1349_v20 = vpop.f32.mrf.mxu0 }
 0x135   : > { %v2749_v3 = vadd.f32 %v1347_v4, %v1300_v17  ;;  %v568_v4 = vld [vmem:[#allocation2 + $0xbc] sm:$0xf] }
 0x136   : > { %v1484_v17 = vshrl.u32 %v568_v4, 16 }
 0x138   : > { %v1173_v34 = vpop.f32.mrf.mxu2  ;;  %v1486_v56 = vrot.slane %v1484_v17, 7 }
 0x139   : > { %v1203_v14 = vadd.f32 %v1173_v34, %v957_v10  ;;  %v1271_v43 = vpop.f32.mrf.mxu3  ;;  %v1487_v34 = vshll.u32 %v568_v4, 16 }
 0x13a   : > { %v959_v36 = vpop.f32.mrf.mxu1 }
 0x13b   : > { %v1301_v44 = vadd.f32 %v1271_v43, %v1203_v14  ;;  %v960_v23 = vadd.f32 %v959_v36, %v2657_v57  ;;  %v1493_v14 = vshrl.u32 %v569_v5, 16  ;;  %v1496_v43 = vshll.u32 %v569_v5, 16 }
 0x13c   : > { %v1352_v42 = vpop.f32.mrf.mxu0 }
 0x13d   : > { %2054 = vmatmul.msk.bf16.gmra.mxu1 %vm801_vm5, %v2607_v48  ;;  %2064 = vmatmul.msk.bf16.gmra.mxu2 %vm801_vm5, %v2609_v49  ;;  %v2755_v39 = vadd.f32 %v1349_v20, %v1301_v44  ;;  %v1389_v48 = vrot.slane %v1221_v41, 5  ;;  %v1388_v49 = vrot.slane %v1218_v27, 4 }
 0x13e   : > { %2077 = vmatmul.msk.bf16.gmra.mxu3 %vm801_vm5, %v2426_v2  ;;  %v1392_v2 = vrot.slane %v1230_v37, 5 }
 0x13f   : > { %2086 = vmatmul.msk.bf16.gmra.mxu0 %vm801_vm5, %v2633_v29  ;;  %v1390_v7 = vor.u32 %v1389_v48, %v1388_v49 }
 0x140   : > { %v1176_v45 = vpop.f32.mrf.mxu2  ;;  %v1395_v41 = vor.u32 %v1394_v40, %v1392_v2 }
 0x141   : > { %v1204_v50 = vadd.f32 %v1176_v45, %v960_v23  ;;  %v1274_v38 = vpop.f32.mrf.mxu3  ;;  %v1391_v28 = vrot.slane %v1390_v7, 4  ;;  %v567_v45 = vld [vmem:[#allocation2 + $0xb8] sm:$0x8] }
 0x142   : > { %v961_v24 = vpop.f32.mrf.mxu1  ;;  %v1396_v37 = vrot.slane %v1395_v41, 4 }
 0x143   : > { %v1302_v53 = vadd.f32 %v1274_v38, %v1204_v50  ;;  %v962_v57 = vadd.f32 %v961_v24, %v2671_v11  ;;  %v1400_v11 = vrot.slane %v1398_v0, 5  ;;  %v1655_v50 = vrot.slane %v1487_v34, 5 }
 0x144   : > { %v1354_v54 = vpop.f32.mrf.mxu0  ;;  %v1658_v38 = vrot.slane %v1496_v43, 5  ;;  %v1660_v24 = vrot.slane %v1493_v14, 4 }
 0x145   : > { %v2770_v31 = vadd.f32 %v1352_v42, %v1302_v53  ;;  %v1654_v42 = vrot.slane %v1484_v17, 4 }
 0x146   : > { %v1661_v7 = vor.u32 %v1660_v24, %v1658_v38 }
 0x148   : > { %v1178_v6 = vpop.f32.mrf.mxu2 }
 0x149   : > { %v1205_v47 = vadd.f32 %v1178_v6, %v962_v57  ;;  %v1276_v26 = vpop.f32.mrf.mxu3  ;;  %v1479_v57 = vshrl.u32 %v567_v45, 16  ;;  %v1495_v6 = vrot.slane %v1493_v14, 7 }
 0x14a   : > { %v964_v61 = vpop.f32.mrf.mxu1 }
 0x14b   : > { %v1303_v12 = vadd.f32 %v1276_v26, %v1205_v47  ;;  %v965_v1 = vadd.f32 %v964_v61, %v2691_v21  ;;  %v1656_v61 = vor.u32 %v1655_v50, %v1654_v42  ;;  %v2058_v0 = vrot.slane %v1479_v57, 11 }
 0x14c   : > { %v1357_v27 = vpop.f32.mrf.mxu0 }
 0x14d   : > { %2055 = vmatmul.msk.bf16.gmra.mxu1 %vm801_vm5, %v2633_v29  ;;  %2065 = vmatmul.msk.bf16.gmra.mxu2 %vm801_vm5, %v2635_v30  ;;  %v2777_v13 = vadd.f32 %v1354_v54, %v1303_v12  ;;  %v1393_v30 = vsel %vm2495_vm10, %v1391_v28, %v1392_v2  ;;  %v579_v54 = vld [vmem:[#allocation2 + $0xc4] sm:$0x1]  ;;  %v1489_v12 = vor.u32 %v1487_v34, %v1486_v56 }
 0x14e   : > { %2078 = vmatmul.msk.bf16.gmra.mxu3 %vm801_vm5, %v2477_v46  ;;  %v1401_v46 = vsel %vm2495_vm10, %v1396_v37, %v1400_v11  ;;  %v1404_v21 = vunpack.c.l.b16 %v1393_v30  ;;  %v1664_v41 = vshll.u32 %v579_v54, 16  ;;  %v1498_v28 = vor.u32 %v1496_v43, %v1495_v6 }
 0x14f   : > { %2087 = vmatmul.msk.bf16.gmra.mxu0 %vm801_vm5, %v2675_v16  ;;  %v1405_v44 = vunpack.c.l.b16 %v1401_v46  ;;  %v1657_v11 = vrot.slane %v1656_v61, 4 }
 0x150   : > { %v1181_v59 = vpop.f32.mrf.mxu2  ;;  %v1666_v4 = vrot.slane %v1664_v41, 5 }
 0x151   : > { %v1206_v29 = vadd.f32 %v1181_v59, %v965_v1  ;;  %v1279_v8 = vpop.f32.mrf.mxu3  ;;  %v1406_v40 = vpack.c.b16 %v1405_v44, %v1404_v21  ;;  %v1662_v1 = vrot.slane %v1661_v7, 4  ;;  %v1659_v30 = vsel %vm2495_vm10, %v1657_v11, %v1658_v38 }
 0x152   : > { %v966_v9 = vpop.f32.mrf.mxu1 }
 0x153   : > { %v1304_v10 = vadd.f32 %v1279_v8, %v1206_v29  ;;  %v967_v23 = vadd.f32 %v966_v9, %v2697_v32  ;;  %v1490_v29 = vsel %vm2483_vm9, %v2058_v0, %v1489_v12 }
 0x154   : > { %v1359_v20 = vpop.f32.mrf.mxu0  ;;  %v1502_v46 = vunpack.c.l.b16 %v1490_v29 }
 0x155   : > { %v2788_v36 = vadd.f32 %v1357_v27, %v1304_v10  ;;  %v1491_v27 = vrot.slane %v1486_v56, 4 }
 0x158   : > { %v1183_v53 = vpop.f32.mrf.mxu2 }
 0x159   : > { %v1207_v48 = vadd.f32 %v1183_v53, %v967_v23  ;;  %v1281_v49 = vpop.f32.mrf.mxu3  ;;  %v2105_v23 = vld [vmem:[#allocation2 + $0xbc] sm:$0xff] }
 0x15a   : > { %v969_v2 = vpop.f32.mrf.mxu1 }
 0x15b   : > { %v1305_v47 = vadd.f32 %v1281_v49, %v1207_v48  ;;  %v970_v37 = vadd.f32 %v969_v2, %v2659_v58  ;;  %v1667_v58 = vsel %vm2495_vm10, %v1662_v1, %v1666_v4 }
 0x15c   : > { %v1362_v26 = vpop.f32.mrf.mxu0  ;;  %v1671_v34 = vunpack.c.l.b16 %v1667_v58 }
 0x15d   : > { %2056 = vmatmul.msk.bf16.gmra.mxu1 %vm801_vm5, %v2675_v16  ;;  %2066 = vmatmul.msk.bf16.gmra.mxu2 %vm801_vm5, %v2679_v18  ;;  %v2795_v32 = vadd.f32 %v1359_v20, %v1305_v47  ;;  %v1670_v20 = vunpack.c.l.b16 %v1659_v30 }
 0x15e   : > { %2079 = vmatmul.msk.bf16.gmra.mxu3 %vm801_vm5, %v2681_v19  ;;  %v1499_v19 = vsel %vm2483_vm9, %v1491_v27, %v1498_v28 }
 0x15f   : > { %2088 = vmatmul.msk.bf16.gmra.mxu0 %vm801_vm5, %v1406_v40  ;;  %v1503_v17 = vunpack.c.l.b16 %v1499_v19  ;;  %v1672_v45 = vpack.c.b16 %v1671_v34, %v1670_v20 }
 0x160   : > { %v1186_v16 = vpop.f32.mrf.mxu2 }
 0x161   : > { %v1208_v59 = vadd.f32 %v1186_v16, %v970_v37  ;;  %v1284_v5 = vpop.f32.mrf.mxu3  ;;  %v1504_v44 = vpack.c.b16 %v1503_v17, %v1502_v46 }
 0x162   : > { %v971_v18 = vpop.f32.mrf.mxu1 }
 0x163   : > { %v1306_v8 = vadd.f32 %v1284_v5, %v1208_v59  ;;  %v972_v14 = vadd.f32 %v971_v18, %v2673_v15 }
 0x164   : > { %v1364_v9 = vpop.f32.mrf.mxu0 }
 0x165   : > { %v2809_v10 = vadd.f32 %v1362_v26, %v1306_v8 }
 0x168   : > { %v1188_v43 = vpop.f32.mrf.mxu2 }
 0x169   : > { %v1209_v21 = vadd.f32 %v1188_v43, %v972_v14  ;;  %v1286_v52 = vpop.f32.mrf.mxu3 }
 0x16a   : > { %v974_v42 = vpop.f32.mrf.mxu1 }
 0x16b   : > { %v1307_v50 = vadd.f32 %v1286_v52, %v1209_v21  ;;  %v975_v15 = vadd.f32 %v974_v42, %v2693_v22 }
 0x16c   : > { %v1367_v38 = vpop.f32.mrf.mxu0 }
 0x16d   : > { %2057 = vmatmul.msk.bf16.gmra.mxu1 %vm801_vm5, %v1406_v40  ;;  %2067 = vmatmul.msk.bf16.gmra.mxu2 %vm801_vm5, %v1504_v44  ;;  %v2814_v60 = vadd.f32 %v1364_v9, %v1307_v50 }
 0x16e   : > { %2080 = vmatmul.msk.bf16.gmra.mxu3 %vm801_vm5, %v2105_v23 }
 0x16f   : > { %2089 = vmatmul.msk.bf16.gmra.mxu0 %vm801_vm5, %v1672_v45 }
 0x170   : > { %v1191_v24 = vpop.f32.mrf.mxu2 }
 0x171   : > { %v1210_v53 = vadd.f32 %v1191_v24, %v975_v15  ;;  %v1289_v54 = vpop.f32.mrf.mxu3 }
 0x172   : > { %v976_v48 = vpop.f32.mrf.mxu1 }
 0x173   : > { %v1308_v49 = vadd.f32 %v1289_v54, %v1210_v53  ;;  %v977_v40 = vadd.f32 %v976_v48, %v2699_v33  ;;  %v2828_v33 = vld [vmem:[%s2912_s4] ss:$0 sm:$0xff] }
 0x174   : > { %v1369_v2 = vpop.f32.mrf.mxu0 }
 0x175   : > { %v2819_v57 = vadd.f32 %v1367_v38, %v1308_v49 }
 0x178   : > { %v1193_v56 = vpop.f32.mrf.mxu2 }
 0x179   : > { %v1211_v6 = vadd.f32 %v1193_v56, %v977_v40  ;;  %v1291_v47 = vpop.f32.mrf.mxu3 }
 0x17a   : > { %v1422_v26 = vpop.f32.mrf.mxu1 }
 0x17b   : > { %v1309_v61 = vadd.f32 %v1291_v47, %v1211_v6  ;;  %v1462_v22 = vadd.f32 %v1422_v26, %v2709_v55 }
 0x17c   : > { %v1688_v7 = vpop.f32.mrf.mxu0 }
 0x17d   : > { %v2822_v41 = vadd.f32 %v1369_v2, %v1309_v61 }
 0x180   : > { %v1520_v0 = vpop.f32.mrf.mxu2 }
 0x181   : > { %v1560_v12 = vadd.f32 %v1520_v0, %v1462_v22  ;;  %v1598_v27 = vpop.f32.mrf.mxu3 }
 0x182   : > { %v1424_v28 = vpop.f32.mrf.mxu1 }
 0x183   : > { %v1638_v37 = vadd.f32 %v1598_v27, %v1560_v12  ;;  %v1463_v16 = vadd.f32 %v1424_v28, %v2715_v63 }
 0x184   : > { %v1690_v11 = vpop.f32.mrf.mxu0 }
 0x185   : > { %v1728_v1 = vadd.f32 %v1688_v7, %v1638_v37 }
 0x187   : > { %v1748_v4 = vadd.f32 %v2828_v33, %v1728_v1 }
 0x188   : > { %v1522_v59 = vpop.f32.mrf.mxu2 }
 0x189   : > { %1764 = vst.msk [vmem:[%s2283_s10] sm:$0xff] %vm801_vm5, %v1748_v4  ;;  %v1561_v55 = vadd.f32 %v1522_v59, %v1463_v16  ;;  %v1600_v5 = vpop.f32.mrf.mxu3 }
 0x18a   : > { %v1427_v18 = vpop.f32.mrf.mxu1 }
 0x18b   : > { %v1639_v29 = vadd.f32 %v1600_v5, %v1561_v55  ;;  %v1464_v30 = vadd.f32 %v1427_v18, %v2721_v35 }
 0x18c   : > { %v1693_v19 = vpop.f32.mrf.mxu0 }
 0x18d   : > { %v1729_v8 = vadd.f32 %v1690_v11, %v1639_v29 }
 0x18f   : > { %v1749_v9 = vadd.f32 %v2828_v33, %v1729_v8 }
 0x190   : > { %v1525_v58 = vpop.f32.mrf.mxu2 }
 0x191   : > { %1765 = vst.msk [vmem:[%s2283_s10 + $0x8] sm:$0xff] %vm801_vm5, %v1749_v9  ;;  %v1562_v46 = vadd.f32 %v1525_v58, %v1464_v30  ;;  %v1603_v17 = vpop.f32.mrf.mxu3 }
 0x192   : > { %v1429_v63 = vpop.f32.mrf.mxu1 }
 0x193   : > { %v1640_v20 = vadd.f32 %v1603_v17, %v1562_v46  ;;  %v1465_v21 = vadd.f32 %v1429_v63, %v2728_v51 }
 0x194   : > { %v1695_v34 = vpop.f32.mrf.mxu0 }
 0x195   : > { %v1730_v14 = vadd.f32 %v1693_v19, %v1640_v20 }
 0x197   : > { %v1750_v43 = vadd.f32 %v2828_v33, %v1730_v14 }
 0x198   : > { %v1527_v52 = vpop.f32.mrf.mxu2 }
 0x199   : > { %1766 = vst.msk [vmem:[%s2283_s10 + $0x10] sm:$0xff] %vm801_vm5, %v1750_v43  ;;  %v1563_v44 = vadd.f32 %v1527_v52, %v1465_v21  ;;  %v1605_v42 = vpop.f32.mrf.mxu3 }
 0x19a   : > { %v1432_v35 = vpop.f32.mrf.mxu1 }
 0x19b   : > { %v1641_v23 = vadd.f32 %v1605_v42, %v1563_v44  ;;  %v1466_v15 = vadd.f32 %v1432_v35, %v2735_v25 }
 0x19c   : > { %v1698_v45 = vpop.f32.mrf.mxu0 }
 0x19d   : > { %v1731_v50 = vadd.f32 %v1695_v34, %v1641_v23 }
 0x19f   : > { %v1751_v38 = vadd.f32 %v2828_v33, %v1731_v50 }
 0x1a0   : > { %v1530_v24 = vpop.f32.mrf.mxu2 }
 0x1a1   : > { %1767 = vst.msk [vmem:[%s2283_s10 + $0x18] sm:$0xff] %vm801_vm5, %v1751_v38  ;;  %v1564_v53 = vadd.f32 %v1530_v24, %v1466_v15  ;;  %v1608_v54 = vpop.f32.mrf.mxu3 }
 0x1a2   : > { %v1434_v51 = vpop.f32.mrf.mxu1 }
 0x1a3   : > { %v1642_v48 = vadd.f32 %v1608_v54, %v1564_v53  ;;  %v1467_v56 = vadd.f32 %v1434_v51, %v2742_v62 }
 0x1a4   : > { %v1700_v49 = vpop.f32.mrf.mxu0 }
 0x1a5   : > { %v1732_v2 = vadd.f32 %v1698_v45, %v1642_v48 }
 0x1a7   : > { %v1752_v40 = vadd.f32 %v2828_v33, %v1732_v2 }
 0x1a8   : > { %v1532_v6 = vpop.f32.mrf.mxu2 }
 0x1a9   : > { %1768 = vst.msk [vmem:[%s2283_s10 + $0x20] sm:$0xff] %vm801_vm5, %v1752_v40  ;;  %v1565_v47 = vadd.f32 %v1532_v6, %v1467_v56  ;;  %v1610_v26 = vpop.f32.mrf.mxu3 }
 0x1aa   : > { %v1437_v25 = vpop.f32.mrf.mxu1 }
 0x1ab   : > { %v1643_v61 = vadd.f32 %v1610_v26, %v1565_v47  ;;  %v1468_v12 = vadd.f32 %v1437_v25, %v2749_v3 }
 0x1ac   : > { %v1703_v7 = vpop.f32.mrf.mxu0 }
 0x1ad   : > { %v1733_v22 = vadd.f32 %v1700_v49, %v1643_v61 }
 0x1af   : > { %v1753_v0 = vadd.f32 %v2828_v33, %v1733_v22 }
 0x1b0   : > { %v1535_v27 = vpop.f32.mrf.mxu2 }
 0x1b1   : > { %1769 = vst.msk [vmem:[%s2283_s10 + $0x28] sm:$0xff] %vm801_vm5, %v1753_v0  ;;  %v1566_v28 = vadd.f32 %v1535_v27, %v1468_v12  ;;  %v1613_v37 = vpop.f32.mrf.mxu3 }
 0x1b2   : > { %v1439_v62 = vpop.f32.mrf.mxu1 }
 0x1b3   : > { %v1644_v11 = vadd.f32 %v1613_v37, %v1566_v28  ;;  %v1469_v59 = vadd.f32 %v1439_v62, %v2755_v39 }
 0x1b4   : > { %v1705_v1 = vpop.f32.mrf.mxu0 }
 0x1b5   : > { %v1734_v4 = vadd.f32 %v1703_v7, %v1644_v11 }
 0x1b7   : > { %v1754_v16 = vadd.f32 %v2828_v33, %v1734_v4 }
 0x1b8   : > { %v1537_v55 = vpop.f32.mrf.mxu2 }
 0x1b9   : > { %1770 = vst.msk [vmem:[%s2283_s10 + $0x30] sm:$0xff] %vm801_vm5, %v1754_v16  ;;  %v1567_v5 = vadd.f32 %v1537_v55, %v1469_v59  ;;  %v1615_v18 = vpop.f32.mrf.mxu3 }
 0x1ba   : > { %v1442_v3 = vpop.f32.mrf.mxu1 }
 0x1bb   : > { %v1645_v29 = vadd.f32 %v1615_v18, %v1567_v5  ;;  %v1470_v30 = vadd.f32 %v1442_v3, %v2770_v31 }
 0x1bc   : > { %v1708_v19 = vpop.f32.mrf.mxu0 }
 0x1bd   : > { %v1735_v8 = vadd.f32 %v1705_v1, %v1645_v29 }
 0x1bf   : > { %v1755_v9 = vadd.f32 %v2828_v33, %v1735_v8 }
 0x1c0   : > { %v1540_v58 = vpop.f32.mrf.mxu2 }
 0x1c1   : > { %1771 = vst.msk [vmem:[%s2283_s10 + $0x38] sm:$0xff] %vm801_vm5, %v1755_v9  ;;  %v1568_v46 = vadd.f32 %v1540_v58, %v1470_v30  ;;  %v1618_v17 = vpop.f32.mrf.mxu3 }
 0x1c2   : > { %v1444_v39 = vpop.f32.mrf.mxu1 }
 0x1c3   : > { %v1646_v63 = vadd.f32 %v1618_v17, %v1568_v46  ;;  %v1471_v43 = vadd.f32 %v1444_v39, %v2777_v13 }
 0x1c4   : > { %v1710_v20 = vpop.f32.mrf.mxu0 }
 0x1c5   : > { %v1736_v34 = vadd.f32 %v1708_v19, %v1646_v63 }
 0x1c7   : > { %v1756_v14 = vadd.f32 %v2828_v33, %v1736_v34 }
 0x1c8   : > { %v1542_v21 = vpop.f32.mrf.mxu2 }
 0x1c9   : > { %1772 = vst.msk [vmem:[%s2283_s10 + $0x40] sm:$0xff] %vm801_vm5, %v1756_v14  ;;  %v1569_v52 = vadd.f32 %v1542_v21, %v1471_v43  ;;  %v1620_v44 = vpop.f32.mrf.mxu3 }
 0x1ca   : > { %v1447_v31 = vpop.f32.mrf.mxu1 }
 0x1cb   : > { %v1647_v42 = vadd.f32 %v1620_v44, %v1569_v52  ;;  %v1472_v50 = vadd.f32 %v1447_v31, %v2788_v36 }
 0x1cc   : > { %v1713_v35 = vpop.f32.mrf.mxu0 }
 0x1cd   : > { %v1737_v23 = vadd.f32 %v1710_v20, %v1647_v42 }
 0x1cf   : > { %v1757_v45 = vadd.f32 %v2828_v33, %v1737_v23 }
 0x1d0   : > { %v1545_v38 = vpop.f32.mrf.mxu2 }
 0x1d1   : > { %1773 = vst.msk [vmem:[%s2283_s10 + $0x48] sm:$0xff] %vm801_vm5, %v1757_v45  ;;  %v1570_v15 = vadd.f32 %v1545_v38, %v1472_v50  ;;  %v1623_v24 = vpop.f32.mrf.mxu3 }
 0x1d2   : > { %v1449_v13 = vpop.f32.mrf.mxu1 }
 0x1d3   : > { %v1648_v53 = vadd.f32 %v1623_v24, %v1570_v15  ;;  %v1473_v49 = vadd.f32 %v1449_v13, %v2795_v32 }
 0x1d4   : > { %v1715_v54 = vpop.f32.mrf.mxu0 }
 0x1d5   : > { %v1738_v51 = vadd.f32 %v1713_v35, %v1648_v53 }
 0x1d7   : > { %v1758_v48 = vadd.f32 %v2828_v33, %v1738_v51 }
 0x1d8   : > { %v1547_v2 = vpop.f32.mrf.mxu2 }
 0x1d9   : > { %1774 = vst.msk [vmem:[%s2283_s10 + $0x50] sm:$0xff] %vm801_vm5, %v1758_v48  ;;  %v1571_v40 = vadd.f32 %v1547_v2, %v1473_v49  ;;  %v1625_v56 = vpop.f32.mrf.mxu3 }
 0x1da   : > { %v1452_v36 = vpop.f32.mrf.mxu1 }
 0x1db   : > { %v1649_v6 = vadd.f32 %v1625_v56, %v1571_v40  ;;  %v1474_v61 = vadd.f32 %v1452_v36, %v2809_v10 }
 0x1dc   : > { %v1718_v26 = vpop.f32.mrf.mxu0 }
 0x1dd   : > { %v1739_v47 = vadd.f32 %v1715_v54, %v1649_v6 }
 0x1df   : > { %v1759_v25 = vadd.f32 %v2828_v33, %v1739_v47 }
 0x1e0   : > { %v1550_v7 = vpop.f32.mrf.mxu2 }
 0x1e1   : > { %1775 = vst.msk [vmem:[%s2283_s10 + $0x58] sm:$0xff] %vm801_vm5, %v1759_v25  ;;  %v1572_v22 = vadd.f32 %v1550_v7, %v1474_v61  ;;  %v1628_v0 = vpop.f32.mrf.mxu3 }
 0x1e2   : > { %v1454_v32 = vpop.f32.mrf.mxu1 }
 0x1e3   : > { %v1650_v12 = vadd.f32 %v1628_v0, %v1572_v22  ;;  %v1475_v37 = vadd.f32 %v1454_v32, %v2814_v60 }
 0x1e4   : > { %v1720_v62 = vpop.f32.mrf.mxu0 }
 0x1e5   : > { %v1740_v27 = vadd.f32 %v1718_v26, %v1650_v12 }
 0x1e7   : > { %v1760_v28 = vadd.f32 %v2828_v33, %v1740_v27 }
 0x1e8   : > { %v1552_v11 = vpop.f32.mrf.mxu2 }
 0x1e9   : > { %1776 = vst.msk [vmem:[%s2283_s10 + $0x60] sm:$0xff] %vm801_vm5, %v1760_v28  ;;  %v1573_v1 = vadd.f32 %v1552_v11, %v1475_v37  ;;  %v1630_v4 = vpop.f32.mrf.mxu3 }
 0x1ea   : > { %v1457_v10 = vpop.f32.mrf.mxu1 }
 0x1eb   : > { %v1651_v16 = vadd.f32 %v1630_v4, %v1573_v1  ;;  %v1476_v5 = vadd.f32 %v1457_v10, %v2819_v57 }
 0x1ec   : > { %v1723_v29 = vpop.f32.mrf.mxu0 }
 0x1ed   : > { %v1741_v59 = vadd.f32 %v1720_v62, %v1651_v16 }
 0x1ef   : > { %v1761_v55 = vadd.f32 %v2828_v33, %v1741_v59 }
 0x1f0   : > { %v1555_v18 = vpop.f32.mrf.mxu2 }
 0x1f1   : > { %1777 = vst.msk [vmem:[%s2283_s10 + $0x68] sm:$0xff] %vm801_vm5, %v1761_v55  ;;  %v1574_v3 = vadd.f32 %v1555_v18, %v1476_v5  ;;  %v1633_v60 = vpop.f32.mrf.mxu3 }
 0x1f2   : > { %v1459_v8 = vpop.f32.mrf.mxu1 }
 0x1f3   : > { %v1652_v19 = vadd.f32 %v1633_v60, %v1574_v3  ;;  %v1477_v58 = vadd.f32 %v1459_v8, %v2822_v41 }
 0x1f4   : > { %v1725_v63 = vpop.f32.mrf.mxu0 }
 0x1f5   : > { %v1742_v9 = vadd.f32 %v1723_v29, %v1652_v19 }
 0x1f7   : > { %v1762_v30 = vadd.f32 %v2828_v33, %v1742_v9 }
 0x1f8   : > { %v1557_v46 = vpop.f32.mrf.mxu2 }
 0x1f9   : > { %1778 = vst.msk [vmem:[%s2283_s10 + $0x70] sm:$0xff] %vm801_vm5, %v1762_v30  ;;  %v1575_v17 = vadd.f32 %v1557_v46, %v1477_v58  ;;  %v1635_v39 = vpop.f32.mrf.mxu3 }
 0x1fb   : > { %v1653_v57 = vadd.f32 %v1635_v39, %v1575_v17 }
 0x1fd   : > { %v1743_v20 = vadd.f32 %v1725_v63, %v1653_v57 }
 0x1ff   : > { %v1763_v34 = vadd.f32 %v2828_v33, %v1743_v20 }
 0x201   : > { %1779 = vst.msk [vmem:[%s2283_s10 + $0x78] sm:$0xff] %vm801_vm5, %v1763_v34 }
 0x202 PF: > { %s15_s22 = sadd.s32 1, %s2189_s22   ;;  %s2920_s18 = smov %s2181_s20 }
 0x203   : > { %p12_p12 = scmp.ge.s32.totalorder %s15_s22, 6   ;;  %s2921_s19 = smov %s2185_s21 }
 0x204   : > { %s2922_s20 = smov %s2925_s23  ;;  %s2923_s21 = smov %s2929_s24 }
 0x205   :  { %14 = sbr.rel (!%p12_p12) target bundleno = 3 (0x3), region = 94 }

</bundles_post_ra>
